<compile_context>
chip_gen: v7x
topology: tpu7x:2x2x1
jax: 0.10.0
libtpu: 0.0.40
codegen_flags: <defaults>
</compile_context>

<pallas_src>
import functools
import math

import jax
import jax.numpy as jnp
from jax import lax
from jax.experimental import pallas as pl
from jax.experimental.pallas import tpu as pltpu


# ---------------------------------------------------------------------------
# Helpers
# ---------------------------------------------------------------------------
def _round_up(x, m):
    return ((x + m - 1) // m) * m


def _leaky(x):
    return jnp.where(x > 0, x, 0.01 * x)  # nn.LeakyReLU default negative_slope=0.01


def _vmem_limit_bytes():
    """~3/4 of physical VMEM (v5e/v6e: 128 MiB, v7x: 64 MiB), capped at 100 MiB."""
    try:
        cap = int(pltpu.get_tpu_info().vmem_capacity_bytes)
    except Exception:  # conservative fallback, safe on every generation
        cap = 64 * 1024 * 1024
    return int(min(cap * 3 // 4, 100 * 1024 * 1024))


def _pick_tile_n(n, k, budget=20 * 1024 * 1024):
    """Largest query tile (multiple of 8) dividing N whose working set fits the budget."""
    for t in (1024, 512, 256, 128, 64, 32, 16, 8):
        if n % t:
            continue
        # neighbour tile (lane-padded, double buffered) + score/exp scratch + misc
        approx = 2 * (t * k * 128 * 2) + 3 * (t * n * 4) + 4 * (t * 128 * 4)
        if approx <= budget:
            return t
    return n  # fall back to one tile covering all points


# ---------------------------------------------------------------------------
# Plain-JAX glue: kNN + neighbour gather + shared q/k/v projection.
# TODO(synk): top_k and the index gather have no clean Pallas TPU equivalent.
# ---------------------------------------------------------------------------
def _knn_and_gather(f_in, k):
    B, D, N = f_in.shape
    inner = -2.0 * jnp.einsum("bdm,bdn->bmn", f_in, f_in)        # (B, N, N)
    xx = jnp.sum(f_in * f_in, axis=1, keepdims=True)             # (B, 1, N)
    pairwise = -xx - inner - jnp.transpose(xx, (0, 2, 1))        # -||xi - xj||^2
    _, idx = lax.top_k(pairwise, k)                              # (B, N, k)
    x_t = jnp.transpose(f_in, (0, 2, 1))                         # (B, N, D)
    neighbor = jax.vmap(lambda pts, ind: pts[ind])(x_t, idx)     # (B, N, k, D)
    return x_t, neighbor.reshape(B, N * k, D)


# ---------------------------------------------------------------------------
# Pallas kernel: fused localConv + attention + semConv + fullConv
# for one (batch, query-tile) grid point.
# ---------------------------------------------------------------------------
def _semantic_conv_kernel(inv_sqrt_d, k,
                          ngh_ref,            # (TN*k, D) bf16  gathered neighbour coords
                          x_ref,              # (TN, D)   bf16  centre coords (query rows)
                          q_ref,              # (TN, D)   bf16  shared qkv proj, query rows
                          kv_ref,             # (N, D)    bf16  shared qkv proj, all rows
                          kvt_ref,            # (D, N)    bf16  pre-transposed keys
                          wc_ref, wn_ref, wnrm_ref, bl_ref,   # localConv folded (split)
                          ws_ref, bs_ref,                     # semConv folded
                          wf_ref, bf_ref,                     # fullConv folded (stacked)
                          o_ref):             # (TN, Op)  f32
    tn, d = x_ref.shape
    op = o_ref.shape[-1]

    # ---------------- Intra-channel (local / edge) branch ----------------
    ngh = ngh_ref[...].astype(jnp.float32)                                   # (TN*k, D)
    ctr = x_ref[...].astype(jnp.float32)                                     # (TN, D)

    # localConv over the (centre, neighbour, ||diff||) concat expressed as a split matmul:
    # the 2D+1 channel concat is never built and the centre term is per-point, not per-edge.
    ngh_term = jnp.dot(ngh, wn_ref[...], preferred_element_type=jnp.float32)  # (TN*k, Op)
    ngh_term = ngh_term.reshape(tn, k, op)
    diff = ngh.reshape(tn, k, d) - ctr[:, None, :]
    nrm = jnp.sqrt(jnp.sum(diff * diff, axis=-1, keepdims=True))              # (TN, k, 1)
    per_edge = ngh_term + nrm * wnrm_ref[...]                                 # (TN, k, Op)
    ctr_term = jnp.dot(ctr, wc_ref[...], preferred_element_type=jnp.float32)  # (TN, Op)
    # bias + LeakyReLU are monotone and the centre term is neighbour-independent, so they
    # commute with the max over neighbours (identical result, ~k x less VPU work).
    intra = _leaky(jnp.max(per_edge, axis=1) + ctr_term + bl_ref[...])        # (TN, Op)

    # ---------------- Inter-channel (attention) branch ----------------
    q = q_ref[...].astype(jnp.float32) * inv_sqrt_d                           # (TN, D)
    kt = kvt_ref[...].astype(jnp.float32)                                     # (D, N)
    kv = kv_ref[...].astype(jnp.float32)                                      # (N, D)
    s = jnp.dot(q, kt, preferred_element_type=jnp.float32)                    # (TN, N)
    s = s - jnp.max(s, axis=-1, keepdims=True)
    e = jnp.exp(s)
    denom = jnp.sum(e, axis=-1, keepdims=True)                                # (TN, 1)
    # Deferred softmax normalisation: scale the (TN, D) result, not the (TN, N) weights.
    fgt = jnp.dot(e, kv, preferred_element_type=jnp.float32)                  # (TN, D)
    fgt = fgt * pl.reciprocal(denom, approx=True)
    inter = _leaky(jnp.dot(fgt, ws_ref[...], preferred_element_type=jnp.float32)
                   + bs_ref[...])                                             # (TN, Op)

    # ---------------- Fuse: concat + fullConv as a single MXU matmul ----------------
    fused = jnp.concatenate([intra, inter], axis=-1)                          # (TN, 2*Op)
    out = jnp.dot(fused, wf_ref[...], preferred_element_type=jnp.float32) + bf_ref[...]
    o_ref[...] = _leaky(out)


# ---------------------------------------------------------------------------
# Wrapper: layout, tiling, pallas_call.
# ---------------------------------------------------------------------------
@functools.partial(jax.jit, static_argnames=("in_dim", "out_dim", "neighboursnum"))
def semantic_conv_forward(f_in, params, in_dim, out_dim, neighboursnum):
    """f_in: (B, in_dim, N) float32 -> (B, out_dim, N) float32 (same as PyTorch)."""
    B, D, N = f_in.shape
    assert D == in_dim
    k = neighboursnum
    Op = _round_up(out_dim, 128)      # lane-dense output channels (sliced off afterwards)
    TN = _pick_tile_n(N, k)

    x_t, neighbor = _knn_and_gather(f_in, k)                        # (B,N,D), (B,N*k,D)
    # Shared q/k/v projection (the 3 proj convs are identical deepcopies) -> one matmul.
    qkv = jnp.einsum("bnd,de->bne", x_t, params["w_att"]) + params["b_att"]   # (B, N, D)

    # bf16 HBM storage for the streamed activations; in-kernel compute stays f32.
    neighbor = neighbor.astype(jnp.bfloat16)
    x_bf = x_t.astype(jnp.bfloat16)
    kv = qkv.astype(jnp.bfloat16)
    kvt = jnp.transpose(kv, (0, 2, 1))                                        # (B, D, N)

    def padw(w):  # zero-pad output channels only (weights are tiny)
        return jnp.pad(w, ((0, 0), (0, Op - w.shape[1])))

    wl = params["w_local"]                          # (2D+1, out_dim), BN folded
    w_c = padw(wl[:D])                              # centre channels      (D, Op)
    w_n = padw(wl[D:2 * D])                         # neighbour channels   (D, Op)
    w_r = padw(wl[2 * D:2 * D + 1])                 # norm channel         (1, Op)
    b_l = padw(params["b_local"])                   # (1, Op)
    w_s = padw(params["w_sem"])                     # (D, Op)
    b_s = padw(params["b_sem"])                     # (1, Op)
    # fullConv: cat([intra, inter]) @ w_full  ==  [intra | inter] @ [[w_fi],[w_fe]]
    w_fi = jnp.pad(params["w_full"][:out_dim], ((0, Op - out_dim), (0, Op - out_dim)))
    w_fe = jnp.pad(params["w_full"][out_dim:], ((0, Op - out_dim), (0, Op - out_dim)))
    w_f = jnp.concatenate([w_fi, w_fe], axis=0)     # (2*Op, Op)
    b_f = padw(params["b_full"])                    # (1, Op)

    kernel = functools.partial(_semantic_conv_kernel, 1.0 / math.sqrt(D), k)

    flops = int(2 * B * N * k * D * Op + 4 * B * N * D * Op
                + 4 * B * N * N * D + 4 * B * N * Op * Op)
    transcendentals = int(B * N * N + B * N * k)
    bytes_accessed = int(2 * B * N * k * D + 2 * B * N * D * 4
                         + 4 * (3 * D * Op + 2 * Op * Op + 4 * Op)
                         + 4 * B * N * Op)

    out_nd = pl.pallas_call(
        kernel,
        out_shape=jax.ShapeDtypeStruct((B, N, Op), jnp.float32),
        grid_spec=pltpu.PrefetchScalarGridSpec(
            num_scalar_prefetch=0,
            grid=(B, N // TN),
            in_specs=[
                pl.BlockSpec((None, TN * k, D), lambda b, n: (b, n, 0)),   # neighbours
                pl.BlockSpec((None, TN, D), lambda b, n: (b, n, 0)),       # centres
                pl.BlockSpec((None, TN, D), lambda b, n: (b, n, 0)),       # q (query rows)
                pl.BlockSpec((None, N, D), lambda b, n: (b, 0, 0)),        # keys/values
                pl.BlockSpec((None, D, N), lambda b, n: (b, 0, 0)),        # keys transposed
                pl.BlockSpec((D, Op), lambda b, n: (0, 0)),                # w_c
                pl.BlockSpec((D, Op), lambda b, n: (0, 0)),                # w_n
                pl.BlockSpec((1, Op), lambda b, n: (0, 0)),                # w_nrm
                pl.BlockSpec((1, Op), lambda b, n: (0, 0)),                # b_local
                pl.BlockSpec((D, Op), lambda b, n: (0, 0)),                # w_sem
                pl.BlockSpec((1, Op), lambda b, n: (0, 0)),                # b_sem
                pl.BlockSpec((2 * Op, Op), lambda b, n: (0, 0)),           # w_full stacked
                pl.BlockSpec((1, Op), lambda b, n: (0, 0)),                # b_full
            ],
            out_specs=pl.BlockSpec((None, TN, Op), lambda b, n: (b, n, 0)),
        ),
        compiler_params=pltpu.CompilerParams(
            dimension_semantics=("parallel", "parallel"),
            vmem_limit_bytes=_vmem_limit_bytes(),
        ),
        cost_estimate=pl.CostEstimate(flops=flops, transcendentals=transcendentals,
                                      bytes_accessed=bytes_accessed),
    )(neighbor, x_bf, kv, kv, kvt, w_c, w_n, w_r, b_l, w_s, b_s, w_f, b_f)

    # Slice off channel padding, return PyTorch layout (B, out_dim, N).
    return jnp.transpose(out_nd[:, :, :out_dim], (0, 2, 1))


# ---------------------------------------------------------------------------
# Deterministic parameter init (shapes from SemanticConv.__init__), BN folded.
# The fold takes the real running statistics (here: fresh-module values 0 / 1).
# ---------------------------------------------------------------------------
def init_params(key, in_dim, out_dim):
    D, C2 = in_dim, 2 * in_dim + 1
    keys = jax.random.split(key, 11)

    def uinit(kk, shape, fan_in):
        bound = 1.0 / math.sqrt(fan_in)
        return jax.random.uniform(kk, shape, jnp.float32, -bound, bound)

    # Raw conv weights in PyTorch layout (out_channels, in_channels).
    w_local_raw = uinit(keys[0], (out_dim, C2), C2)                  # localConv, no bias
    w_att_raw = uinit(keys[1], (D, D), D)                            # semAtt (shared q/k/v)
    b_att_raw = uinit(keys[2], (D,), D)
    w_sem_raw = uinit(keys[3], (out_dim, D), D)                      # semConv, no bias
    w_full_raw = uinit(keys[4], (out_dim, 2 * out_dim), 2 * out_dim)  # fullConv, no bias

    def bn_fold(w_raw, gamma, beta, running_mean, running_var, eps=1e-5):
        scale = gamma / jnp.sqrt(running_var + eps)
        w_eff = (w_raw * scale[:, None]).T.astype(jnp.float32)      # (cin, out)
        b_eff = (beta - running_mean * scale).reshape(1, -1).astype(jnp.float32)
        return w_eff, b_eff

    def bn_stats(k1, k2):
        gamma = 1.0 + 0.1 * jax.random.normal(k1, (out_dim,))
        beta = 0.1 * jax.random.normal(k2, (out_dim,))
        return gamma, beta, jnp.zeros((out_dim,)), jnp.ones((out_dim,))

    w_local, b_local = bn_fold(w_local_raw, *bn_stats(keys[5], keys[6]))
    w_sem, b_sem = bn_fold(w_sem_raw, *bn_stats(keys[7], keys[8]))
    w_full, b_full = bn_fold(w_full_raw, *bn_stats(keys[9], keys[10]))

    return dict(
        w_local=w_local, b_local=b_local,
        w_att=w_att_raw.T.astype(jnp.float32),
        b_att=b_att_raw.reshape(1, D).astype(jnp.float32),
        w_sem=w_sem, b_sem=b_sem,
        w_full=w_full, b_full=b_full,
    )


if __name__ == "__main__":
    B, in_dim, N = 2, 4, 16
    out_dim = 8
    neighboursnum = 8     # k <= N

    key = jax.random.PRNGKey(0)
    k_x, k_p = jax.random.split(key)
    f_in = jax.random.normal(k_x, (B, in_dim, N), dtype=jnp.float32)
    params = init_params(k_p, in_dim, out_dim)

    out = semantic_conv_forward(f_in, params, in_dim=in_dim, out_dim=out_dim,
                                neighboursnum=neighboursnum)
    out = jax.block_until_ready(out)
    assert out.shape == (B, out_dim, N), out.shape
    assert bool(jnp.all(jnp.isfinite(out)))
    print("KERNEL_OK")
</pallas_src>

<mosaic_0001>
module attributes {stable_mosaic.version = 11 : i64} {
  func.func @_semantic_conv_kernel(%arg0: i32, %arg1: i32, %arg2: memref<1x128x4xbf16, #tpu.memory_space<vmem>>, %arg3: memref<1x16x4xbf16, #tpu.memory_space<vmem>>, %arg4: memref<1x16x4xbf16, #tpu.memory_space<vmem>>, %arg5: memref<1x16x4xbf16, #tpu.memory_space<vmem>>, %arg6: memref<1x4x16xbf16, #tpu.memory_space<vmem>>, %arg7: memref<4x128xf32, #tpu.memory_space<vmem>>, %arg8: memref<4x128xf32, #tpu.memory_space<vmem>>, %arg9: memref<1x128xf32, #tpu.memory_space<vmem>>, %arg10: memref<1x128xf32, #tpu.memory_space<vmem>>, %arg11: memref<4x128xf32, #tpu.memory_space<vmem>>, %arg12: memref<1x128xf32, #tpu.memory_space<vmem>>, %arg13: memref<256x128xf32, #tpu.memory_space<vmem>>, %arg14: memref<1x128xf32, #tpu.memory_space<vmem>>, %arg15: memref<1x16x128xf32, #tpu.memory_space<vmem>>) attributes {dimension_semantics = [#tpu.dimension_semantics<parallel>, #tpu.dimension_semantics<parallel>], iteration_bounds = array<i64: 2, 1>, scalar_prefetch = 0 : i64, scratch_operands = 0 : i64, tpu.core_type = #tpu.core_type<tc>, window_params = [{transform_indices = @transform_0, window_bounds = array<i64: 1, 128, 4>}, {transform_indices = @transform_1, window_bounds = array<i64: 1, 16, 4>}, {transform_indices = @transform_2, window_bounds = array<i64: 1, 16, 4>}, {transform_indices = @transform_3, window_bounds = array<i64: 1, 16, 4>}, {transform_indices = @transform_4, window_bounds = array<i64: 1, 4, 16>}, {pipeline_mode = #tpu.pipeline_mode<synchronous>, transform_indices = @transform_5, window_bounds = array<i64: 4, 128>}, {pipeline_mode = #tpu.pipeline_mode<synchronous>, transform_indices = @transform_6, window_bounds = array<i64: 4, 128>}, {pipeline_mode = #tpu.pipeline_mode<synchronous>, transform_indices = @transform_7, window_bounds = array<i64: 1, 128>}, {pipeline_mode = #tpu.pipeline_mode<synchronous>, transform_indices = @transform_8, window_bounds = array<i64: 1, 128>}, {pipeline_mode = #tpu.pipeline_mode<synchronous>, transform_indices = @transform_9, window_bounds = array<i64: 4, 128>}, {pipeline_mode = #tpu.pipeline_mode<synchronous>, transform_indices = @transform_10, window_bounds = array<i64: 1, 128>}, {pipeline_mode = #tpu.pipeline_mode<synchronous>, transform_indices = @transform_11, window_bounds = array<i64: 256, 128>}, {pipeline_mode = #tpu.pipeline_mode<synchronous>, transform_indices = @transform_12, window_bounds = array<i64: 1, 128>}, {transform_indices = @transform_13, window_bounds = array<i64: 1, 16, 128>}]} {
    %c0 = arith.constant 0 : index
    %c0_0 = arith.constant 0 : index
    %c0_1 = arith.constant 0 : index
    %0 = vector.load %arg2[%c0, %c0_0, %c0_1] : memref<1x128x4xbf16, #tpu.memory_space<vmem>>, vector<1x128x4xbf16>
    %1 = vector.shape_cast %0 : vector<1x128x4xbf16> to vector<128x4xbf16>
    %2 = arith.extf %1 : vector<128x4xbf16> to vector<128x4xf32>
    %c0_2 = arith.constant 0 : index
    %c0_3 = arith.constant 0 : index
    %c0_4 = arith.constant 0 : index
    %3 = vector.load %arg3[%c0_2, %c0_3, %c0_4] : memref<1x16x4xbf16, #tpu.memory_space<vmem>>, vector<1x16x4xbf16>
    %4 = vector.shape_cast %3 : vector<1x16x4xbf16> to vector<16x4xbf16>
    %5 = arith.extf %4 : vector<16x4xbf16> to vector<16x4xf32>
    %c0_5 = arith.constant 0 : index
    %c0_6 = arith.constant 0 : index
    %6 = vector.load %arg8[%c0_5, %c0_6] : memref<4x128xf32, #tpu.memory_space<vmem>>, vector<4x128xf32>
    %cst = arith.constant dense<0.000000e+00> : vector<128x128xf32>
    %7 = tpu.matmul %2, %6, %cst {dimension_numbers = #tpu.dot_dimension_numbers<[1], [0], [0], [1], [0, 0, 1, 1], [], []>} : vector<128x4xf32>, vector<4x128xf32>, vector<128x128xf32> -> vector<128x128xf32>
    %8 = vector.shape_cast %7 : vector<128x128xf32> to vector<16x8x128xf32>
    %9 = vector.shape_cast %2 : vector<128x4xf32> to vector<16x8x4xf32>
    %10 = vector.shape_cast %5 : vector<16x4xf32> to vector<16x1x4xf32>
    %11 = vector.broadcast %10 : vector<16x1x4xf32> to vector<16x8x4xf32>
    %12 = arith.subf %9, %11 : vector<16x8x4xf32>
    %13 = arith.mulf %12, %12 : vector<16x8x4xf32>
    %cst_7 = arith.constant dense<0.000000e+00> : vector<16x8xf32>
    %14 = vector.multi_reduction <add>, %13, %cst_7 [2] : vector<16x8x4xf32> to vector<16x8xf32>
    %15 = vector.shape_cast %14 : vector<16x8xf32> to vector<16x8x1xf32>
    %16 = math.sqrt %15 : vector<16x8x1xf32>
    %c0_8 = arith.constant 0 : index
    %c0_9 = arith.constant 0 : index
    %17 = vector.load %arg9[%c0_8, %c0_9] : memref<1x128xf32, #tpu.memory_space<vmem>>, vector<1x128xf32>
    %18 = vector.shape_cast %17 : vector<1x128xf32> to vector<1x1x128xf32>
    %19 = vector.broadcast %16 : vector<16x8x1xf32> to vector<16x8x128xf32>
    %20 = vector.broadcast %18 : vector<1x1x128xf32> to vector<16x8x128xf32>
    %21 = arith.mulf %19, %20 : vector<16x8x128xf32>
    %22 = arith.addf %8, %21 : vector<16x8x128xf32>
    %c0_10 = arith.constant 0 : index
    %c0_11 = arith.constant 0 : index
    %23 = vector.load %arg7[%c0_10, %c0_11] : memref<4x128xf32, #tpu.memory_space<vmem>>, vector<4x128xf32>
    %cst_12 = arith.constant dense<0.000000e+00> : vector<16x128xf32>
    %24 = tpu.matmul %5, %23, %cst_12 {dimension_numbers = #tpu.dot_dimension_numbers<[1], [0], [0], [1], [0, 0, 1, 1], [], []>} : vector<16x4xf32>, vector<4x128xf32>, vector<16x128xf32> -> vector<16x128xf32>
    %cst_13 = arith.constant dense<0xFF800000> : vector<16x128xf32>
    %25 = vector.multi_reduction <maximumf>, %22, %cst_13 [1] : vector<16x8x128xf32> to vector<16x128xf32>
    %26 = arith.addf %25, %24 : vector<16x128xf32>
    %c0_14 = arith.constant 0 : index
    %c0_15 = arith.constant 0 : index
    %27 = vector.load %arg10[%c0_14, %c0_15] : memref<1x128xf32, #tpu.memory_space<vmem>>, vector<1x128xf32>
    %28 = vector.broadcast %27 : vector<1x128xf32> to vector<16x128xf32>
    %29 = arith.addf %26, %28 : vector<16x128xf32>
    %cst_16 = arith.constant 0.000000e+00 : f32
    %30 = vector.broadcast %cst_16 : f32 to vector<16x128xf32>
    %31 = arith.cmpf ogt, %29, %30 : vector<16x128xf32>
    %cst_17 = arith.constant 0.00999999977 : f32
    %32 = vector.broadcast %cst_17 : f32 to vector<16x128xf32>
    %33 = arith.mulf %32, %29 : vector<16x128xf32>
    %34 = arith.select %31, %29, %33 : vector<16x128xi1>, vector<16x128xf32>
    %c0_18 = arith.constant 0 : index
    %c0_19 = arith.constant 0 : index
    %c0_20 = arith.constant 0 : index
    %35 = vector.load %arg4[%c0_18, %c0_19, %c0_20] : memref<1x16x4xbf16, #tpu.memory_space<vmem>>, vector<1x16x4xbf16>
    %36 = vector.shape_cast %35 : vector<1x16x4xbf16> to vector<16x4xbf16>
    %37 = arith.extf %36 : vector<16x4xbf16> to vector<16x4xf32>
    %cst_21 = arith.constant 5.000000e-01 : f32
    %38 = vector.broadcast %cst_21 : f32 to vector<16x4xf32>
    %39 = arith.mulf %37, %38 : vector<16x4xf32>
    %c0_22 = arith.constant 0 : index
    %c0_23 = arith.constant 0 : index
    %c0_24 = arith.constant 0 : index
    %40 = vector.load %arg6[%c0_22, %c0_23, %c0_24] : memref<1x4x16xbf16, #tpu.memory_space<vmem>>, vector<1x4x16xbf16>
    %41 = vector.shape_cast %40 : vector<1x4x16xbf16> to vector<4x16xbf16>
    %42 = arith.extf %41 : vector<4x16xbf16> to vector<4x16xf32>
    %c0_25 = arith.constant 0 : index
    %c0_26 = arith.constant 0 : index
    %c0_27 = arith.constant 0 : index
    %43 = vector.load %arg5[%c0_25, %c0_26, %c0_27] : memref<1x16x4xbf16, #tpu.memory_space<vmem>>, vector<1x16x4xbf16>
    %44 = vector.shape_cast %43 : vector<1x16x4xbf16> to vector<16x4xbf16>
    %45 = arith.extf %44 : vector<16x4xbf16> to vector<16x4xf32>
    %cst_28 = arith.constant dense<0.000000e+00> : vector<16x16xf32>
    %46 = tpu.matmul %39, %42, %cst_28 {dimension_numbers = #tpu.dot_dimension_numbers<[1], [0], [0], [1], [0, 0, 1, 1], [], []>} : vector<16x4xf32>, vector<4x16xf32>, vector<16x16xf32> -> vector<16x16xf32>
    %cst_29 = arith.constant dense<0xFF800000> : vector<16xf32>
    %47 = vector.multi_reduction <maximumf>, %46, %cst_29 [1] : vector<16x16xf32> to vector<16xf32>
    %48 = vector.shape_cast %47 : vector<16xf32> to vector<16x1xf32>
    %49 = vector.broadcast %48 : vector<16x1xf32> to vector<16x16xf32>
    %50 = arith.subf %46, %49 : vector<16x16xf32>
    %51 = math.exp %50 : vector<16x16xf32>
    %cst_30 = arith.constant dense<0.000000e+00> : vector<16xf32>
    %52 = vector.multi_reduction <add>, %51, %cst_30 [1] : vector<16x16xf32> to vector<16xf32>
    %53 = vector.shape_cast %52 : vector<16xf32> to vector<16x1xf32>
    %cst_31 = arith.constant dense<0.000000e+00> : vector<16x4xf32>
    %54 = tpu.matmul %51, %45, %cst_31 {dimension_numbers = #tpu.dot_dimension_numbers<[1], [0], [0], [1], [0, 0, 1, 1], [], []>} : vector<16x16xf32>, vector<16x4xf32>, vector<16x4xf32> -> vector<16x4xf32>
    %55 = tpu.reciprocal %53 {approx = true} : vector<16x1xf32> -> vector<16x1xf32>
    %56 = vector.broadcast %55 : vector<16x1xf32> to vector<16x4xf32>
    %57 = arith.mulf %54, %56 : vector<16x4xf32>
    %c0_32 = arith.constant 0 : index
    %c0_33 = arith.constant 0 : index
    %58 = vector.load %arg11[%c0_32, %c0_33] : memref<4x128xf32, #tpu.memory_space<vmem>>, vector<4x128xf32>
    %cst_34 = arith.constant dense<0.000000e+00> : vector<16x128xf32>
    %59 = tpu.matmul %57, %58, %cst_34 {dimension_numbers = #tpu.dot_dimension_numbers<[1], [0], [0], [1], [0, 0, 1, 1], [], []>} : vector<16x4xf32>, vector<4x128xf32>, vector<16x128xf32> -> vector<16x128xf32>
    %c0_35 = arith.constant 0 : index
    %c0_36 = arith.constant 0 : index
    %60 = vector.load %arg12[%c0_35, %c0_36] : memref<1x128xf32, #tpu.memory_space<vmem>>, vector<1x128xf32>
    %61 = vector.broadcast %60 : vector<1x128xf32> to vector<16x128xf32>
    %62 = arith.addf %59, %61 : vector<16x128xf32>
    %cst_37 = arith.constant 0.000000e+00 : f32
    %63 = vector.broadcast %cst_37 : f32 to vector<16x128xf32>
    %64 = arith.cmpf ogt, %62, %63 : vector<16x128xf32>
    %cst_38 = arith.constant 0.00999999977 : f32
    %65 = vector.broadcast %cst_38 : f32 to vector<16x128xf32>
    %66 = arith.mulf %65, %62 : vector<16x128xf32>
    %67 = arith.select %64, %62, %66 : vector<16x128xi1>, vector<16x128xf32>
    %68 = tpu.concatenate %34, %67 in 1 : vector<16x128xf32>, vector<16x128xf32> -> vector<16x256xf32>
    %c0_39 = arith.constant 0 : index
    %c0_40 = arith.constant 0 : index
    %69 = vector.load %arg13[%c0_39, %c0_40] : memref<256x128xf32, #tpu.memory_space<vmem>>, vector<256x128xf32>
    %cst_41 = arith.constant dense<0.000000e+00> : vector<16x128xf32>
    %70 = tpu.matmul %68, %69, %cst_41 {dimension_numbers = #tpu.dot_dimension_numbers<[1], [0], [0], [1], [0, 0, 1, 1], [], []>} : vector<16x256xf32>, vector<256x128xf32>, vector<16x128xf32> -> vector<16x128xf32>
    %c0_42 = arith.constant 0 : index
    %c0_43 = arith.constant 0 : index
    %71 = vector.load %arg14[%c0_42, %c0_43] : memref<1x128xf32, #tpu.memory_space<vmem>>, vector<1x128xf32>
    %72 = vector.broadcast %71 : vector<1x128xf32> to vector<16x128xf32>
    %73 = arith.addf %70, %72 : vector<16x128xf32>
    %cst_44 = arith.constant 0.000000e+00 : f32
    %74 = vector.broadcast %cst_44 : f32 to vector<16x128xf32>
    %75 = arith.cmpf ogt, %73, %74 : vector<16x128xf32>
    %cst_45 = arith.constant 0.00999999977 : f32
    %76 = vector.broadcast %cst_45 : f32 to vector<16x128xf32>
    %77 = arith.mulf %76, %73 : vector<16x128xf32>
    %78 = arith.select %75, %73, %77 : vector<16x128xi1>, vector<16x128xf32>
    %c0_46 = arith.constant 0 : index
    %c0_47 = arith.constant 0 : index
    %c0_48 = arith.constant 0 : index
    %79 = vector.load %arg15[%c0_46, %c0_47, %c0_48] : memref<1x16x128xf32, #tpu.memory_space<vmem>>, vector<1x16x128xf32>
    %80 = vector.shape_cast %79 : vector<1x16x128xf32> to vector<16x128xf32>
    %81 = vector.shape_cast %78 : vector<16x128xf32> to vector<1x16x128xf32>
    tpu.vector_store %arg15[%c0_46, %c0_47, %c0_48], %81 {strides = array<i32>} : memref<1x16x128xf32, #tpu.memory_space<vmem>>, vector<1x16x128xf32>,
    return
  }
  func.func @transform_0(%arg0: i32, %arg1: i32) -> (i32, i32, i32) {
    %c0_i32 = arith.constant 0 : i32
    %c0_i32_0 = arith.constant 0 : i32
    return %arg0, %arg1, %c0_i32 : i32, i32, i32
  }
  func.func @transform_1(%arg0: i32, %arg1: i32) -> (i32, i32, i32) {
    %c0_i32 = arith.constant 0 : i32
    %c0_i32_0 = arith.constant 0 : i32
    return %arg0, %arg1, %c0_i32 : i32, i32, i32
  }
  func.func @transform_2(%arg0: i32, %arg1: i32) -> (i32, i32, i32) {
    %c0_i32 = arith.constant 0 : i32
    %c0_i32_0 = arith.constant 0 : i32
    return %arg0, %arg1, %c0_i32 : i32, i32, i32
  }
  func.func @transform_3(%arg0: i32, %arg1: i32) -> (i32, i32, i32) {
    %c0_i32 = arith.constant 0 : i32
    %c0_i32_0 = arith.constant 0 : i32
    %c0_i32_1 = arith.constant 0 : i32
    return %arg0, %c0_i32, %c0_i32_0 : i32, i32, i32
  }
  func.func @transform_4(%arg0: i32, %arg1: i32) -> (i32, i32, i32) {
    %c0_i32 = arith.constant 0 : i32
    %c0_i32_0 = arith.constant 0 : i32
    %c0_i32_1 = arith.constant 0 : i32
    return %arg0, %c0_i32, %c0_i32_0 : i32, i32, i32
  }
  func.func @transform_5(%arg0: i32, %arg1: i32) -> (i32, i32) {
    %c0_i32 = arith.constant 0 : i32
    %c0_i32_0 = arith.constant 0 : i32
    %c0_i32_1 = arith.constant 0 : i32
    return %c0_i32, %c0_i32_0 : i32, i32
  }
  func.func @transform_6(%arg0: i32, %arg1: i32) -> (i32, i32) {
    %c0_i32 = arith.constant 0 : i32
    %c0_i32_0 = arith.constant 0 : i32
    %c0_i32_1 = arith.constant 0 : i32
    return %c0_i32, %c0_i32_0 : i32, i32
  }
  func.func @transform_7(%arg0: i32, %arg1: i32) -> (i32, i32) {
    %c0_i32 = arith.constant 0 : i32
    %c0_i32_0 = arith.constant 0 : i32
    %c0_i32_1 = arith.constant 0 : i32
    return %c0_i32, %c0_i32_0 : i32, i32
  }
  func.func @transform_8(%arg0: i32, %arg1: i32) -> (i32, i32) {
    %c0_i32 = arith.constant 0 : i32
    %c0_i32_0 = arith.constant 0 : i32
    %c0_i32_1 = arith.constant 0 : i32
    return %c0_i32, %c0_i32_0 : i32, i32
  }
  func.func @transform_9(%arg0: i32, %arg1: i32) -> (i32, i32) {
    %c0_i32 = arith.constant 0 : i32
    %c0_i32_0 = arith.constant 0 : i32
    %c0_i32_1 = arith.constant 0 : i32
    return %c0_i32, %c0_i32_0 : i32, i32
  }
  func.func @transform_10(%arg0: i32, %arg1: i32) -> (i32, i32) {
    %c0_i32 = arith.constant 0 : i32
    %c0_i32_0 = arith.constant 0 : i32
    %c0_i32_1 = arith.constant 0 : i32
    return %c0_i32, %c0_i32_0 : i32, i32
  }
  func.func @transform_11(%arg0: i32, %arg1: i32) -> (i32, i32) {
    %c0_i32 = arith.constant 0 : i32
    %c0_i32_0 = arith.constant 0 : i32
    %c0_i32_1 = arith.constant 0 : i32
    return %c0_i32, %c0_i32_0 : i32, i32
  }
  func.func @transform_12(%arg0: i32, %arg1: i32) -> (i32, i32) {
    %c0_i32 = arith.constant 0 : i32
    %c0_i32_0 = arith.constant 0 : i32
    %c0_i32_1 = arith.constant 0 : i32
    return %c0_i32, %c0_i32_0 : i32, i32
  }
  func.func @transform_13(%arg0: i32, %arg1: i32) -> (i32, i32, i32) {
    %c0_i32 = arith.constant 0 : i32
    %c0_i32_0 = arith.constant 0 : i32
    return %arg0, %arg1, %c0_i32 : i32, i32, i32
  }
}

</mosaic_0001>

<bundles_post_ra>
// kernel: neg.5
= control target key start
LH: loop header
LB: loop body
LE: loop exit
PB: predicated region body
PF: predicated region fallthrough
CT: control target
= control target key end

     0   :  { %s24_s0 = inlined_call_operand.vmem [shape: f32[2,16], index: 0, kind: input, shape index: {}]   ;;  %s25_s1 = inlined_call_operand.vmem [shape: f32[2,16], index: 1, kind: output, shape index: {}]  }
   0x1   :  { %v2_v0 = vld [vmem:[%s24_s0] sm:$0x3] }
   0x2   :  { %v5_v1 = vxor.u32 2147483648, %v2_v0 }
   0x4   :  { %7 = vst [vmem:[%s25_s1] sm:$0x3] %v5_v1 }

// kernel: semantic_conv_forward.1
= control target key start
LH: loop header
LB: loop body
LE: loop exit
PB: predicated region body
PF: predicated region fallthrough
CT: control target
= control target key end

     0   :  { %s2571_s25 = smov 0   ;;  %s2573_s26 = smov 0   ;;  %s3276_s0 = inlined_call_operand.vmem [shape: bf16[2,128,4], index: 0, kind: input, shape index: {}]   ;;  %s3277_s1 = inlined_call_operand.vmem [shape: bf16[2,16,4], index: 1, kind: input, shape index: {}]   ;;  %s3278_s2 = inlined_call_operand.vmem [shape: bf16[2,16,4], index: 2, kind: input, shape index: {}, may-alias: {2,3}]   ;;  %s3279_s3 = inlined_call_operand.vmem [shape: bf16[2,16,4], index: 3, kind: input, shape index: {}, may-alias: {2,3}]   ;;  %s3280_s4 = inlined_call_operand.vmem [shape: bf16[2,4,16], index: 4, kind: input, shape index: {}]   ;;  %s3281_s5 = inlined_call_operand.vmem [shape: f32[4,128], index: 5, kind: input, shape index: {}]   ;;  %s3282_s6 = inlined_call_operand.vmem [shape: f32[4,128], index: 6, kind: input, shape index: {}]   ;;  %s3283_s7 = inlined_call_operand.vmem [shape: f32[1,128], index: 7, kind: input, shape index: {}]   ;;  %s3284_s8 = inlined_call_operand.vmem [shape: f32[1,128], index: 8, kind: input, shape index: {}]   ;;  %s3285_s9 = inlined_call_operand.vmem [shape: f32[4,128], index: 9, kind: input, shape index: {}]   ;;  %s3286_s10 = inlined_call_operand.vmem [shape: f32[1,128], index: 10, kind: input, shape index: {}]   ;;  %s3287_s11 = inlined_call_operand.vmem [shape: f32[256,128], index: 11, kind: input, shape index: {}]   ;;  %s3288_s12 = inlined_call_operand.vmem [shape: f32[1,128], index: 12, kind: input, shape index: {}]   ;;  %s3289_s13 = inlined_call_operand.vmem [shape: f32[2,16,128], index: 13, kind: output, shape index: {}]  }
   0x1   :  { %s2575_s27 = smov 0  }
   0x2 LB: > { %s35_s28 = sadd.s32 1, %s2494_s26  ;;  %p2157_p0 = scmp.ge.s32.totalorder %s2498_s27, 1  ;;  %s2498_s27 = sphi %s2575_s27, %s23_s27   ;;  %s2494_s26 = sphi %s2573_s26, %s3291_s26   ;;  %s2490_s25 = sphi %s2571_s25, %s3290_s25  }
   0x3   : > { %p37_p1 = scmp.ge.s32.totalorder %s35_s28, 2  ;;  %p461_p2 = scmp.lt.s32.totalorder %s2498_s27, 3 }
   0x5   : > { %s3293_s28 = smov (%p37_p1, %s35_s28), 0  ;;  %p462_p3 = pnand %p2157_p0, %p461_p2 }
   0x6   : > { %vm675_vm0 = vcmask (!%p462_p3), 1043456   ;;  %v1235_v0 = vld [vmem:[%s3281_s5] sm:$0xf] (!%p462_p3)  ;;  %p541_p4 = scmp.lt.s32.totalorder (!%p462_p3), %s2490_s25, 1  ;;  %vm626_vm1 = vcmask (!%p462_p3), 31744   ;;  %v830_v38 = vlaneseq (!%p462_p3)  ;;  %vm1629_vm2 = vcmask (!%p462_p3), 130048  }
   0x7   : > { %465 = sbr.rel (%p462_p3) target bundleno = 1060 (0x424), region = 72  ;;  %2353 = vmatprep.subr.msk.mxu1 (!%p462_p3), %vm675_vm0, %v1235_v0  ;;  %v625_v1 = vld [vmem:[%s3282_s6] sm:$0xf] (!%p462_p3)  ;;  %v2500_v36 = vmov (!%p462_p3), 1966171168  }
   0x8   : > { %2354 = vmatpush3.msk.msra.mxu1 (!%p462_p3), %vm675_vm0, %v1235_v0  ;;  %2327 = vmatprep.subr.msk.mxu0 (!%p462_p3), %vm675_vm0, %v625_v1  ;;  %v828_v37 = vunpack.c.l.s4 (!%p462_p3), %v2500_v36  ;;  %v831_v40 = vshrl.u32 (!%p462_p3), %v830_v38, 7 }
   0x9   : > { %2328 = vmatpush3.msk.msra.mxu0 (!%p462_p3), %vm675_vm0, %v625_v1 }
   0xa   : > { %v829_v39 = vunpack.c.0.s8 (!%p462_p3), %v828_v37  ;;  %v2724_v45 = vsub.s32 (!%p462_p3), 0, %v831_v40 }
   0xc   : > { %v2718_v41 = vsub.s32 (!%p462_p3), %v829_v39, %v831_v40 }
   0xe   : > { %s3295_s25 = smov (!%p541_p4, %s2490_s25), 1 }
   0xf   : > { %s2602_s16 = sshll.u32 %s3295_s25, 3  ;;  %s2166_s17 = sshll.u32 %s3295_s25, 1 }
  0x10   : > { %s558_s20 = scalar_lea.vmem %s3277_s1, %s2602_s16  ;;  %s578_s23 = scalar_lea.vmem %s3280_s4, %s2166_s17 }
  0x11   : > { %v2241_v2 = vld [vmem:[%s558_s20] sm:$0xff]   ;;  %s568_s30 = scalar_lea.vmem %s3278_s2, %s2602_s16  ;;  %s2203_s14 = sshll.u32 %s3295_s25, 6 }
  0x12   : > { %v1539_v3 = vld [vmem:[%s578_s23] sm:$0x3]  ;;  %v2617_v4 = vunpack.c.l.bf16 %v2241_v2  ;;  %v2619_v5 = vunpack.c.h.bf16 %v2241_v2  ;;  %s2624_s19 = scalar_lea.vmem %s3276_s0, %s2203_s14  ;;  %s574_s21 = scalar_lea.vmem %s3279_s3, %s2602_s16 }
  0x13   : > { %v1540_v6 = vunpack.c.l.bf16 %v1539_v3  ;;  %v2245_v7 = vld [vmem:[%s568_s30] sm:$0xff]   ;;  %v2630_v11 = vld [vmem:[%s2624_s19 + $0x8] sm:$0xff]   ;;  %v2642_v17 = vld [vmem:[%s2624_s19 + $0x10] sm:$0xff]  }
  0x14   : > { %v2246_v8 = vunpack.c.l.bf16 %v2245_v7  ;;  %v2247_v9 = vunpack.c.h.bf16 %v2245_v7  ;;  %v2627_v10 = vld [vmem:[%s2624_s19] sm:$0xff]   ;;  %2355 = vmatprep.mubr.msk.f32.mxu1 %vm626_vm1, %v2617_v4  ;;  %v2214_v16 = vunpack.c.l.bf16 %v2630_v11  ;;  %v2215_v18 = vunpack.c.h.bf16 %v2630_v11  ;;  %v2656_v20 = vld [vmem:[%s2624_s19 + $0x18] sm:$0xff]   ;;  %v2678_v26 = vld [vmem:[%s2624_s19 + $0x28] sm:$0xff]  }
  0x15   : > { %2358 = vmatprep.subr.msk.mxu1 %vm675_vm0, %v1540_v6  ;;  %2356 = vmatmul.mubr.msk.f32.vlgmr.msra.gmra.mrb[0].mxu1 %vm626_vm1, %v2619_v5  ;;  %v2210_v14 = vunpack.c.l.bf16 %v2627_v10  ;;  %v2211_v15 = vunpack.c.h.bf16 %v2627_v10  ;;  %v2218_v19 = vunpack.c.l.bf16 %v2642_v17  ;;  %v2219_v21 = vunpack.c.h.bf16 %v2642_v17  ;;  %v2667_v23 = vld [vmem:[%s2624_s19 + $0x20] sm:$0xff]   ;;  %v2689_v29 = vld [vmem:[%s2624_s19 + $0x30] sm:$0xff]   ;;  %v2698_v32 = vld [vmem:[%s2624_s19 + $0x38] sm:$0xff]   ;;  %s2207_s19 = sshll.u32 %s3295_s25, 4 }
  0x16   : > { %v1537_v12 = vmul.f32 0.5, %v2246_v8  ;;  %v1538_v13 = vmul.f32 0.5, %v2247_v9  ;;  %2359 = vmatpush3.msk.msra.mxu1 %vm675_vm0, %v1540_v6  ;;  %v2222_v22 = vunpack.c.l.bf16 %v2656_v20  ;;  %v2223_v24 = vunpack.c.h.bf16 %v2656_v20 }
  0x17   : > { %2329 = vmatprep.mubr.msk.f32.mxu0 %vm626_vm1, %v2210_v14  ;;  %v2226_v25 = vunpack.c.l.bf16 %v2667_v23  ;;  %v2227_v27 = vunpack.c.h.bf16 %v2667_v23  ;;  %v2230_v28 = vunpack.c.l.bf16 %v2678_v26  ;;  %v2231_v30 = vunpack.c.h.bf16 %v2678_v26 }
  0x18   : > { %2360 = vmatprep.mubr.msk.f32.mxu1 %vm626_vm1, %v1537_v12  ;;  %2330 = vmatmul.mubr.msk.f32.vlgmr.msra.gmra.mrb[0].mxu0 %vm626_vm1, %v2211_v15  ;;  %v2234_v31 = vunpack.c.l.bf16 %v2689_v29  ;;  %v2235_v33 = vunpack.c.h.bf16 %v2689_v29  ;;  %v2238_v34 = vunpack.c.l.bf16 %v2698_v32  ;;  %v2239_v35 = vunpack.c.h.bf16 %v2698_v32 }
  0x19   : > { %2361 = vmatmul.mubr.msk.f32.vlgmr.msra.gmra.mrb[2].mxu1 %vm626_vm1, %v1538_v13  ;;  %2332 = vmatprep.mubr.msk.f32.mxu0 %vm626_vm1, %v2214_v16  ;;  %v833_v42 = vrot.slane %v2617_v4, %v2718_v41  ;;  %v826_v44 = vcombine.high %v2617_v4, %v2617_v4  ;;  %v882_v47 = vrot.slane %v2619_v5, %v2718_v41 }
  0x1a   : > { %v875_v2 = vcombine.high %v2619_v5, %v2619_v5 }
  0x1b   : > { %v841_v43 = vcombine.high %v833_v42, %v833_v42  ;;  %v2736_v50 = vrot.slane %v833_v42, %v2718_v41  ;;  %v2739_v51 = vrot.slane %v826_v44, %v2718_v41  ;;  %v890_v53 = vcombine.high %v882_v47, %v882_v47 }
  0x1c   : > { %2333 = vmatmul.mubr.msk.f32.gmra.mrb[2].mxu0 %vm626_vm1, %v2215_v18  ;;  %v898_v0 = vrot.slane %v882_v47, %v2718_v41  ;;  %v2775_v5 = vrot.slane %v875_v2, %v2718_v41 }
  0x1d   : > { %2335 = vmatprep.mubr.msk.f32.mxu0 %vm626_vm1, %v2218_v19  ;;  %v2727_v46 = vrot.slane %v841_v43, %v2718_v41  ;;  %v927_v56 = vrot.slane %v2736_v50, %v2724_v45  ;;  %v2749_v57 = vrot.slane %v2739_v51, %v2718_v41  ;;  %v2756_v60 = vrot.slane %v890_v53, %v2718_v41 }
  0x1e   : > { %v920_v8 = vcombine.high %v898_v0, %v898_v0 }
  0x1f   : > { %v931_v49 = vrot.slane %v2727_v46, %v2724_v45  ;;  %v1004_v62 = vsub.f32 %v2210_v14, %v927_v56  ;;  %v943_v63 = vrot.slane %v2749_v57, %v2724_v45  ;;  %v963_v3 = vrot.slane %v2756_v60, %v2724_v45 }
  0x20   : > { %2336 = vmatmul.mubr.msk.f32.gmra.mrb[4].mxu0 %vm626_vm1, %v2219_v21  ;;  %v967_v13 = vrot.slane %v920_v8, %v2724_v45 }
  0x21   : > { %2338 = vmatprep.mubr.msk.f32.mxu0 %vm626_vm1, %v2222_v22  ;;  %v1005_v55 = vsub.f32 %v2211_v15, %v931_v49  ;;  %v1020_v6 = vmul.f32 %v1004_v62, %v1004_v62  ;;  %v1008_v7 = vsub.f32 %v2218_v19, %v943_v63  ;;  %v1013_v9 = vsub.f32 %v2227_v27, %v963_v3 }
  0x22   : > { %v1014_v36 = vsub.f32 %v2230_v28, %v967_v13  ;;  %v959_v19 = vrot.slane %v898_v0, %v2724_v45 }
  0x23   : > { %v1021_v61 = vmul.f32 %v1005_v55, %v1005_v55  ;;  %v1036_v10 = vsel %vm626_vm1, %v1020_v6, 0.0  ;;  %v1024_v12 = vmul.f32 %v1008_v7, %v1008_v7  ;;  %v1029_v14 = vmul.f32 %v1013_v9, %v1013_v9 }
  0x24   : > { %2339 = vmatmul.mubr.msk.f32.gmra.mrb[6].mxu0 %vm626_vm1, %v2223_v24  ;;  %v1030_v38 = vmul.f32 %v1014_v36, %v1014_v36  ;;  %v1012_v39 = vsub.f32 %v2226_v25, %v959_v19 }
  0x25   : > { %2341 = vmatprep.mubr.msk.f32.mxu0 %vm626_vm1, %v2226_v25  ;;  %v1039_v4 = vsel %vm626_vm1, %v1021_v61, 0.0  ;;  %v1048_v15 = vsel %vm626_vm1, %v1024_v12, 0.0  ;;  %v1063_v37 = vsel %vm626_vm1, %v1029_v14, 0.0  ;;  %v2249_v25 = vld [vmem:[%s574_s21] sm:$0xff]   ;;  %s587_s21 = scalar_lea.vmem %s3289_s13, %s2207_s19 }
  0x26   : > { %v1066_v43 = vsel %vm626_vm1, %v1030_v38, 0.0  ;;  %2376 = vmatprep.subr.bf16.mxu1 %v2249_v25 }
  0x27   : > { %2378 = vmatpush3.bf16.msra.mxu1 %v2249_v25 }
  0x28   : > { %2342 = vmatmul.mubr.msk.f32.gmra.mrb[8].mxu0 %vm626_vm1, %v2227_v27  ;;  %v905_v27 = vrot.slane %v2775_v5, %v2718_v41 }
  0x29   : > { %2344 = vmatprep.mubr.msk.f32.mxu0 %vm626_vm1, %v2230_v28  ;;  %v1028_v28 = vmul.f32 %v1012_v39, %v1012_v39  ;;  %v873_v39 = vcombine.high %v2727_v46, %v2727_v46 }
  0x2a   : > { %v975_v40 = vrot.slane %v905_v27, %v2724_v45  ;;  %v921_v42 = vcombine.high %v905_v27, %v905_v27  ;;  %v871_v27 = vcombine.high %v2736_v50, %v2736_v50 }
  0x2b   : > { %v1060_v49 = vsel %vm626_vm1, %v1028_v28, 0.0 }
  0x2c   : > { %2345 = vmatmul.mubr.msk.f32.gmra.mrb[10].mxu0 %vm626_vm1, %v2231_v30  ;;  %v1016_v44 = vsub.f32 %v2234_v31, %v975_v40  ;;  %v983_v47 = vrot.slane %v921_v42, %v2724_v45 }
  0x2d   : > { %2347 = vmatprep.mubr.msk.f32.mxu0 %vm626_vm1, %v2234_v31 }
  0x2e   : > { %v1032_v53 = vmul.f32 %v1016_v44, %v1016_v44  ;;  %v1018_v23 = vsub.f32 %v2238_v34, %v983_v47  ;;  %v922_v47 = vcombine.high %v2756_v60, %v2756_v60 }
  0x30   : > { %2348 = vmatmul.mubr.msk.f32.gmra.mrb[12].mxu0 %vm626_vm1, %v2235_v33  ;;  %v1072_v55 = vsel %vm626_vm1, %v1032_v53, 0.0  ;;  %v1034_v56 = vmul.f32 %v1018_v23, %v1018_v23 }
  0x31   : > { %2350 = vmatprep.mubr.msk.f32.mxu0 %vm626_vm1, %v2238_v34 }
  0x32   : > { %v1078_v31 = vsel %vm626_vm1, %v1034_v56, 0.0 }
  0x34   : > { %2351 = vmatmul.mubr.msk.f32.gmra.mrb[14].mxu0 %vm626_vm1, %v2239_v35 }
  0xe8   : > { %v2731_v48 = vpop.f32.mrb[0].mxu1 }
  0xe9   : > { %v2741_v52 = vpop.f32.mrb[1].mxu1  ;;  %v1423_v25 = vrot.slane %v2731_v48, 1 }
  0xec   : > { %v2743_v54 = vpop.f32.mrb[2].mxu1 }
  0xed   : > { %v2751_v58 = vpop.f32.mrb[3].mxu1  ;;  %v1633_v1 = vsel %vm1629_vm2, %v2743_v54, -inf }
  0xee   : > { %v1630_v59 = vsel %vm1629_vm2, %v2751_v58, -inf }
  0xef   : > { %1631 = vmax.xlane.f32.xlu0 %v1630_v59  ;;  %v2800_v59 = vpop.f32.mrb[0].mxu0 }
  0xf0   : > { %v2802_v61 = vpop.f32.mrb[1].mxu0 }
  0xf1   : > { %v2804_v34 = vpop.f32.mrb[2].mxu0 }
  0xf2   : > { %v2806_v62 = vpop.f32.mrb[3].mxu0 }
  0xf3   : > { %1634 = vmax.xlane.f32.xlu0 %v1633_v1  ;;  %v2808_v63 = vpop.f32.mrb[4].mxu0 }
  0xf4   : > { %v2810_v0 = vpop.f32.mrb[5].mxu0 }
  0xf7   : > { %1040 = vadd.xlane.f32.xlu0 %v1039_v4  ;;  %v2812_v1 = vpop.f32.mrb[6].mxu0 }
  0xf8   : > { %v2814_v2 = vpop.f32.mrb[7].mxu0 }
  0xfb   : > { %1037 = vadd.xlane.f32.xlu0 %v1036_v10  ;;  %v2816_v3 = vpop.f32.mrb[8].mxu0 }
  0xfc   : > { %v2818_v4 = vpop.f32.mrb[9].mxu0 }
  0xff   : > { %1049 = vadd.xlane.f32.xlu0 %v1048_v15  ;;  %v2820_v6 = vpop.f32.mrb[10].mxu0 }
 0x100   : > { %v2822_v7 = vpop.f32.mrb[11].mxu0 }
 0x103   : > { %1064 = vadd.xlane.f32.xlu0 %v1063_v37  ;;  %v2824_v8 = vpop.f32.mrb[12].mxu0  ;;  %v842_v37 = vcombine.high %v2739_v51, %v2739_v51  ;;  %v891_v51 = vcombine.high %v2775_v5, %v2775_v5 }
 0x104   : > { %v2826_v9 = vpop.f32.mrb[13].mxu0 }
 0x105   : > { %v870_v42 = vrot.slane %v842_v37, %v2718_v41 }
 0x107   : > { %1067 = vadd.xlane.f32.xlu0 %v1066_v43  ;;  %v2828_v10 = vpop.f32.mrb[14].mxu0  ;;  %v939_v43 = vrot.slane %v873_v39, %v2724_v45  ;;  %v947_v28 = vrot.slane %v870_v42, %v2724_v45  ;;  %v874_v44 = vcombine.high %v870_v42, %v870_v42 }
 0x108   : > { %v2830_v12 = vpop.f32.mrb[15].mxu0 }
 0x109   : > { %v1009_v11 = vsub.f32 %v2219_v21, %v947_v28 }
 0x10b   : > { %1061 = vadd.xlane.f32.xlu0 %v1060_v49  ;;  %v1025_v39 = vmul.f32 %v1009_v11, %v1009_v11 }
 0x10f   : > { %1073 = vadd.xlane.f32.xlu0 %v1072_v55  ;;  %v971_v55 = vrot.slane %v922_v47, %v2724_v45 }
 0x111   : > { %v1015_v42 = vsub.f32 %v2231_v30, %v971_v55 }
 0x113   : > { %1079 = vadd.xlane.f32.xlu0 %v1078_v31  ;;  %v1416_v31 = vrot.slane %v2741_v52, 1 }
 0x17c   : > { %v1632_v13 = vpop.xlane.xlu0 %1631 }
 0x17d   : > { %v1636_v14 = vsub.f32 %v2751_v58, %v1632_v13  ;;  %v935_v58 = vrot.slane %v871_v27, %v2724_v45 }
 0x17f   : > { %v1638_v15 = vmul.f32 1.442695, %v1636_v14  ;;  %v1006_v46 = vsub.f32 %v2214_v16, %v935_v58  ;;  %v919_v16 = vrot.slane %v891_v51, %v2718_v41  ;;  %v1419_v14 = vrot.slane %v2741_v52, 4 }
 0x180   : > { %v1635_v36 = vpop.xlane.xlu0 %1634 }
 0x181   : > { %2436 = vpow2.f32 %v1638_v15  ;;  %v1637_v19 = vsub.f32 %v2743_v54, %v1635_v36  ;;  %v872_v54 = vcombine.high %v2749_v57, %v2749_v57  ;;  %v1007_v57 = vsub.f32 %v2215_v18, %v939_v43 }
 0x182   : > { %v1022_v60 = vmul.f32 %v1006_v46, %v1006_v46  ;;  %v955_v18 = vrot.slane %v874_v44, %v2724_v45  ;;  %v923_v37 = vcombine.high %v919_v16, %v919_v16 }
 0x183   : > { %v1640_v38 = vmul.f32 1.442695, %v1637_v19  ;;  %v951_v53 = vrot.slane %v872_v54, %v2724_v45  ;;  %v1023_v13 = vmul.f32 %v1007_v57, %v1007_v57  ;;  %v979_v19 = vrot.slane %v919_v16, %v2724_v45 }
 0x184   : > { %v1041_v40 = vpop.xlane.xlu0 %1040  ;;  %v1011_v58 = vsub.f32 %v2223_v24, %v955_v18  ;;  %v987_v30 = vrot.slane %v923_v37, %v2724_v45 }
 0x185   : > { %2438 = vpow2.f32 %v1640_v38  ;;  %v1010_v41 = vsub.f32 %v2222_v22, %v951_v53  ;;  %vm1093_vm3 = vcmp.eq.f32.partialorder %v1041_v40, inf  ;;  %v1096_v21 = vand.u32 2147483648, %v1041_v40  ;;  %v2883_v22 = vld [vmem:[%s3283_s7] ss:$0 sm:$0xff] }
 0x186   : > { %2440 = vrsqrt.f32 %v1041_v40  ;;  %vm1095_vm4 = vcmp.eq.f32.partialorder %v1041_v40, 0.0  ;;  %v1042_v38 = vsel %vm626_vm1, %v1022_v60, 0.0  ;;  %v1045_v51 = vsel %vm626_vm1, %v1023_v13, 0.0 }
 0x187   : > { %v1026_v20 = vmul.f32 %v1010_v41, %v1010_v41  ;;  %v1017_v26 = vsub.f32 %v2235_v33, %v979_v19  ;;  %v1027_v57 = vmul.f32 %v1011_v58, %v1011_v58  ;;  %v1031_v53 = vmul.f32 %v1015_v42, %v1015_v42 }
 0x188   : > { %v2845_v50 = vpop.xlane.xlu0 %1037  ;;  %v1019_v55 = vsub.f32 %v2239_v35, %v987_v30 }
 0x189   : > { %2442 = vrsqrt.f32 %v2845_v50  ;;  %vm1086_vm5 = vcmp.eq.f32.partialorder %v2845_v50, inf  ;;  %v1089_v46 = vand.u32 2147483648, %v2845_v50  ;;  %vm1088_vm6 = vcmp.eq.f32.partialorder %v2845_v50, 0.0 }
 0x18a   : > { %v1054_v45 = vsel %vm626_vm1, %v1026_v20, 0.0  ;;  %v1057_v41 = vsel %vm626_vm1, %v1027_v57, 0.0 }
 0x18b   : > { %v2437_v49 = vpop.eup %2436 }
 0x18c   : > { %2367 = vmatprep.mubr.msk.f32.mxu1 %vm1629_vm2, %v2437_v49  ;;  %v2859_v5 = vpop.xlane.xlu0 %1049  ;;  %v1642_v23 = vsel %vm1629_vm2, %v2437_v49, 0.0  ;;  %v1051_v49 = vsel %vm626_vm1, %v1025_v39, 0.0  ;;  %v2932_v39 = vmul.f32 %v1019_v55, %v1019_v55 }
 0x18d   : > { %2444 = vrsqrt.f32 %v2859_v5  ;;  %1643 = vadd.xlane.f32.xlu1 %v1642_v23  ;;  %vm1114_vm7 = vcmp.eq.f32.partialorder %v2859_v5, inf  ;;  %v1117_v11 = vand.u32 2147483648, %v2859_v5  ;;  %vm1116_vm8 = vcmp.eq.f32.partialorder %v2859_v5, 0.0 }
 0x18f   : > { %v2439_v56 = vpop.eup %2438 }
 0x190   : > { %v2441_v15 = vpop.eup %2440  ;;  %2368 = vmatmul.mubr.msk.f32.vlgmr.msra.gmra.mrb[4].mxu1 %vm1629_vm2, %v2439_v56  ;;  %v2874_v36 = vpop.xlane.xlu0 %1064  ;;  %v1645_v17 = vsel %vm1629_vm2, %v2439_v56, 0.0  ;;  %vm1848_vm2 = vcmask 1041409  }
 0x191   : > { %2446 = vrsqrt.f32 %v2874_v36  ;;  %1646 = vadd.xlane.f32.xlu1 %v1645_v17  ;;  %v1092_v27 = vmul.f32 %v2441_v15, %v1041_v40  ;;  %v2919_v15 = vsel %vm626_vm1, %v1031_v53, 0.0  ;;  %vm1149_vm9 = vcmp.eq.f32.partialorder %v2874_v36, inf }
 0x192   : > { %vm1151_vm10 = vcmp.eq.f32.partialorder %v2874_v36, 0.0 }
 0x193   : > { %v2443_v43 = vpop.eup %2442  ;;  %v1094_v54 = vsel %vm1093_vm3, %v1041_v40, %v1092_v27  ;;  %v1152_v27 = vand.u32 2147483648, %v2874_v36 }
 0x194   : > { %v2892_v28 = vpop.xlane.xlu0 %1067  ;;  %v1097_v44 = vsel %vm1095_vm4, %v1096_v21, %v1094_v54  ;;  %v1085_v47 = vmul.f32 %v2443_v43, %v2845_v50 }
 0x195   : > { %2448 = vrsqrt.f32 %v2892_v28  ;;  %1043 = vadd.xlane.f32.xlu1 %v1042_v38  ;;  %v1204_v24 = vmul.f32 %v2883_v22, %v1097_v44  ;;  %vm1156_vm11 = vcmp.eq.f32.partialorder %v2892_v28, inf  ;;  %vm1158_vm12 = vcmp.eq.f32.partialorder %v2892_v28, 0.0 }
 0x196   : > { %v1087_v40 = vsel %vm1086_vm5, %v2845_v50, %v1085_v47  ;;  %v1159_v44 = vand.u32 2147483648, %v2892_v28 }
 0x197   : > { %v2445_v23 = vpop.eup %2444  ;;  %v1220_v16 = vadd.f32 %v2800_v59, %v1204_v24  ;;  %v1090_v60 = vsel %vm1088_vm6, %v1089_v46, %v1087_v40  ;;  %v1033_v59 = vmul.f32 %v1017_v26, %v1017_v26 }
 0x198   : > { %v2906_v18 = vpop.xlane.xlu0 %1061  ;;  %v1203_v29 = vmul.f32 %v2883_v22, %v1090_v60  ;;  %v1113_v33 = vmul.f32 %v2445_v23, %v2859_v5 }
 0x199   : > { %v1324_v50 = vrot.slane %v1220_v16, 4  ;;  %2450 = vrsqrt.f32 %v2906_v18  ;;  %1046 = vadd.xlane.f32.xlu1 %v1045_v51  ;;  %vm1142_vm13 = vcmp.eq.f32.partialorder %v2906_v18, inf  ;;  %vm1144_vm14 = vcmp.eq.f32.partialorder %v2906_v18, 0.0 }
 0x19a   : > { %v1219_v56 = vadd.f32 %v1203_v29, %v2802_v61  ;;  %v1115_v13 = vsel %vm1114_vm7, %v2859_v5, %v1113_v33  ;;  %v2930_v5 = vsel %vm626_vm1, %v1033_v59, 0.0 }
 0x19b   : > { %v2447_v17 = vpop.eup %2446  ;;  %v1325_v21 = vmax.f32 %v1220_v16, %v1324_v50  ;;  %v1118_v19 = vsel %vm1116_vm8, %v1117_v11, %v1115_v13  ;;  %v1145_v16 = vand.u32 2147483648, %v2906_v18  ;;  %v2957_v11 = vld [vmem:[%s3284_s8] ss:$0 sm:$0xff] }
 0x19c   : > { %v1318_v37 = vrot.slane %v1219_v56, 4  ;;  %v2923_v38 = vpop.xlane.xlu0 %1073  ;;  %v1207_v32 = vmul.f32 %v2883_v22, %v1118_v19  ;;  %v1148_v35 = vmul.f32 %v2447_v17, %v2874_v36 }
 0x19d   : > { %v1326_v61 = vrot.slane %v1325_v21, 2  ;;  %2452 = vrsqrt.f32 %v2923_v38  ;;  %1052 = vadd.xlane.f32.xlu1 %v1051_v49  ;;  %vm1170_vm15 = vcmp.eq.f32.partialorder %v2923_v38, inf  ;;  %vm1172_vm3 = vcmp.eq.f32.partialorder %v2923_v38, 0.0 }
 0x19e   : > { %v1319_v58 = vmax.f32 %v1219_v56, %v1318_v37  ;;  %v1223_v42 = vadd.f32 %v1207_v32, %v2810_v0  ;;  %v1150_v43 = vsel %vm1149_vm9, %v2874_v36, %v1148_v35  ;;  %v1173_v59 = vand.u32 2147483648, %v2923_v38 }
 0x19f   : > { %v2449_v54 = vpop.eup %2448  ;;  %v1327_v51 = vmax.f32 %v1325_v21, %v1326_v61  ;;  %v1153_v46 = vsel %vm1151_vm10, %v1152_v27, %v1150_v43 }
 0x1a0   : > { %v1320_v47 = vrot.slane %v1319_v58, 2  ;;  %v1342_v20 = vrot.slane %v1223_v42, 4  ;;  %v2939_v24 = vpop.xlane.xlu0 %1079  ;;  %v1212_v26 = vmul.f32 %v2883_v22, %v1153_v46  ;;  %v1155_v30 = vmul.f32 %v2449_v54, %v2892_v28 }
 0x1a1   : > { %v1328_v0 = vrot.slane %v1327_v51, 1  ;;  %2454 = vrsqrt.f32 %v2939_v24  ;;  %1055 = vadd.xlane.f32.xlu1 %v1054_v45  ;;  %vm1184_vm4 = vcmp.eq.f32.partialorder %v2939_v24, inf  ;;  %vm1186_vm7 = vcmp.eq.f32.partialorder %v2939_v24, 0.0 }
 0x1a2   : > { %v1321_v36 = vmax.f32 %v1319_v58, %v1320_v47  ;;  %v1343_v40 = vmax.f32 %v1223_v42, %v1342_v20  ;;  %v1228_v49 = vadd.f32 %v2816_v3, %v1212_v26  ;;  %v1157_v57 = vsel %vm1156_vm11, %v2892_v28, %v1155_v30 }
 0x1a3   : > { %v2451_v53 = vpop.eup %2450  ;;  %v1329_v23 = vmax.f32 %v1327_v51, %v1328_v0  ;;  %v1160_v60 = vsel %vm1158_vm12, %v1159_v44, %v1157_v57  ;;  %v1187_v20 = vand.u32 2147483648, %v2939_v24  ;;  %vm1851_vm11 = vcmask 1042434  }
 0x1a4   : > { %v1322_v29 = vrot.slane %v1321_v36, 1  ;;  %v1344_v3 = vrot.slane %v1343_v40, 2  ;;  %v1372_v33 = vrot.slane %v1228_v49, 4  ;;  %v1141_v45 = vmul.f32 %v2451_v53, %v2906_v18 }
 0x1a5   : > { %v1447_v50 = vadd.f32 %v1416_v31, %v1329_v23  ;;  %1058 = vadd.xlane.f32.xlu1 %v1057_v41  ;;  %v1213_v28 = vmul.f32 %v2883_v22, %v1160_v60  ;;  %v1081_v53 = vsel %vm626_vm1, %v2932_v39, 0.0 }
 0x1a6   : > { %v1323_v55 = vmax.f32 %v1321_v36, %v1322_v29  ;;  %v1345_v56 = vmax.f32 %v1343_v40, %v1344_v3  ;;  %v1373_v13 = vmax.f32 %v1228_v49, %v1372_v33  ;;  %v1143_v17 = vsel %vm1142_vm13, %v2906_v18, %v1141_v45 }
 0x1a7   : > { %v2453_v21 = vpop.eup %2452  ;;  %v1470_v19 = vadd.f32 %v2957_v11, %v1447_v50  ;;  %v1146_v31 = vsel %vm1144_vm14, %v1145_v16, %v1143_v17  ;;  %v1229_v41 = vadd.f32 %v1213_v28, %v2822_v7 }
 0x1a8   : > { %v1446_v27 = vadd.f32 %v1323_v55, %v2741_v52  ;;  %v1346_v37 = vrot.slane %v1345_v56, 1  ;;  %v1374_v32 = vrot.slane %v1373_v13, 2  ;;  %v1211_v35 = vmul.f32 %v2883_v22, %v1146_v31 }
 0x1a9   : > { %vm1486_vm5 = vcmp.gt.f32.partialorder %v1470_v19, 0.0  ;;  %v1502_v61 = vmul.f32 0.01, %v1470_v19  ;;  %v1378_v58 = vrot.slane %v1229_v41, 4  ;;  %1070 = vadd.xlane.f32.xlu1 %v2919_v15  ;;  %v1169_v42 = vmul.f32 %v2453_v21, %v2923_v38 }
 0x1aa   : > { %v1469_v18 = vadd.f32 %v2957_v11, %v1446_v27  ;;  %v1347_v43 = vmax.f32 %v1345_v56, %v1346_v37  ;;  %v1375_v54 = vmax.f32 %v1373_v13, %v1374_v32  ;;  %v1227_v7 = vadd.f32 %v1211_v35, %v2818_v4 }
 0x1ab   : > { %v2455_v51 = vpop.eup %2454  ;;  %v1518_v46 = vsel %vm1486_vm5, %v1470_v19, %v1502_v61  ;;  %v1379_v44 = vmax.f32 %v1229_v41, %v1378_v58  ;;  %v1171_v47 = vsel %vm1170_vm15, %v2923_v38, %v1169_v42  ;;  %v1424_v56 = vrot.slane %v2731_v48, 2 }
 0x1ac   : > { %v1847_v26 = vrot.slane %v1518_v46, 7  ;;  %vm1485_vm6 = vcmp.gt.f32.partialorder %v1469_v18, 0.0  ;;  %v1501_v15 = vmul.f32 0.01, %v1469_v18  ;;  %v2985_v30 = vadd.f32 %v1419_v14, %v1347_v43 }
 0x1ad   : > { %v1183_v0 = vmul.f32 %v2455_v51, %v2939_v24  ;;  %v1376_v36 = vrot.slane %v1375_v54, 1  ;;  %v1366_v4 = vrot.slane %v1227_v7, 4  ;;  %v1380_v40 = vrot.slane %v1379_v44, 2  ;;  %1076 = vadd.xlane.f32.xlu1 %v2930_v5 }
 0x1ae   : > { %v1517_v49 = vsel %vm1485_vm6, %v1469_v18, %v1501_v15  ;;  %v1174_v57 = vsel %vm1172_vm3, %v1173_v59, %v1171_v47  ;;  %v1426_v51 = vrot.slane %v2731_v48, 4 }
 0x1af   : > { %v2995_v23 = vsel %vm1848_vm2, %v1847_v26, %v1517_v49  ;;  %v1377_v14 = vmax.f32 %v1375_v54, %v1376_v36  ;;  %v1367_v16 = vmax.f32 %v1227_v7, %v1366_v4  ;;  %v1381_v60 = vmax.f32 %v1379_v44, %v1380_v40 }
 0x1b0   : > { %v1215_v29 = vmul.f32 %v2883_v22, %v1174_v57  ;;  %v1185_v5 = vsel %vm1184_vm4, %v2939_v24, %v1183_v0  ;;  %v1428_v36 = vrot.slane %v2731_v48, 6  ;;  %v1733_v57 = vld [vmem:[%s3285_s9] sm:$0xf] }
 0x1b1   : > { %v1455_v38 = vadd.f32 %v1423_v25, %v1377_v14  ;;  %v1368_v3 = vrot.slane %v1367_v16, 2  ;;  %v1382_v33 = vrot.slane %v1381_v60, 1  ;;  %1082 = vadd.xlane.f32.xlu1 %v1081_v53  ;;  %v1188_v39 = vsel %vm1186_vm7, %v1187_v20, %v1185_v5  ;;  %2370 = vmatprep.subr.msk.mxu1 %vm675_vm0, %v1733_v57  ;;  %v1900_v53 = vld [vmem:[%s3287_s11 + $0x80] sm:$0xff]  ;;  %v1901_v14 = vld [vmem:[%s3287_s11 + $0x88] sm:$0xff]  ;;  %v1902_v5 = vld [vmem:[%s3287_s11 + $0x90] sm:$0xff] }
 0x1b2   : > { %v1231_v45 = vadd.f32 %v1215_v29, %v2826_v9  ;;  %v1217_v50 = vmul.f32 %v2883_v22, %v1188_v39  ;;  %2371 = vmatpush3.msk.msra.mxu1 %vm675_vm0, %v1733_v57  ;;  %v1885_v29 = vld [vmem:[%s3287_s11 + $0x8] sm:$0xff]  ;;  %v1886_v39 = vld [vmem:[%s3287_s11 + $0x10] sm:$0xff] }
 0x1b3   : > { %v1478_v28 = vadd.f32 %v2957_v11, %v1455_v38  ;;  %v1369_v59 = vmax.f32 %v1367_v16, %v1368_v3  ;;  %v1383_v55 = vmax.f32 %v1381_v60, %v1382_v33  ;;  %v1884_v16 = vld [vmem:[%s3287_s11] sm:$0xff]  ;;  %v2379_v60 = vpack.c.bf16 %v1901_v14, %v1900_v53  ;;  %v1903_v38 = vld [vmem:[%s3287_s11 + $0x98] sm:$0xff] }
 0x1b4   : > { %v1390_v13 = vrot.slane %v1231_v45, 4  ;;  %v1233_v24 = vadd.f32 %v1217_v50, %v2830_v12  ;;  %v2381_v3 = vpack.c.bf16 %v1885_v29, %v1884_v16  ;;  %v2383_v33 = vpack.c.bf16 %v1903_v38, %v1902_v5  ;;  %v1904_v50 = vld [vmem:[%s3287_s11 + $0xa0] sm:$0xff] }
 0x1b5   : > { %v1370_v17 = vrot.slane %v1369_v59, 1  ;;  %v1456_v21 = vadd.f32 %v1424_v56, %v1383_v55  ;;  %v1510_v31 = vmul.f32 0.01, %v1478_v28  ;;  %vm1494_vm8 = vcmp.gt.f32.partialorder %v1478_v28, 0.0  ;;  %2380 = vmatprep.subr.bf16.mxu0 %v2379_v60  ;;  %v1888_v56 = vld [vmem:[%s3287_s11 + $0x20] sm:$0xff] }
 0x1b6   : > { %v1391_v25 = vmax.f32 %v1231_v45, %v1390_v13  ;;  %v1402_v19 = vrot.slane %v1233_v24, 4  ;;  %v1887_v45 = vld [vmem:[%s3287_s11 + $0x18] sm:$0xff]  ;;  %2382 = vmatpush3.bf16.msra.mxu0 %v2381_v3  ;;  %v1889_v13 = vld [vmem:[%s3287_s11 + $0x28] sm:$0xff]  ;;  %v1473_v14 = vadd.f32 %v2957_v11, %v2985_v30 }
 0x1b7   : > { %v1371_v41 = vmax.f32 %v1369_v59, %v1370_v17  ;;  %v1479_v27 = vadd.f32 %v2957_v11, %v1456_v21  ;;  %v1526_v42 = vsel %vm1494_vm8, %v1478_v28, %v1510_v31  ;;  %v1905_v28 = vld [vmem:[%s3287_s11 + $0xa8] sm:$0xff]  ;;  %v2385_v59 = vpack.c.bf16 %v1887_v45, %v1886_v39  ;;  %2384 = vmatprep.subr.bf16.mxu0 %v2383_v33  ;;  %v1907_v17 = vld [vmem:[%s3287_s11 + $0xb8] sm:$0xff] }
 0x1b8   : > { %v1392_v9 = vrot.slane %v1391_v25, 2  ;;  %v1403_v37 = vmax.f32 %v1233_v24, %v1402_v19  ;;  %v1868_v46 = vrot.slane %v1526_v42, 7  ;;  %v2387_v55 = vpack.c.bf16 %v1905_v28, %v1904_v50  ;;  %v1906_v24 = vld [vmem:[%s3287_s11 + $0xb0] sm:$0xff]  ;;  %v1891_v31 = vld [vmem:[%s3287_s11 + $0x38] sm:$0xff] }
 0x1b9   : > { %v1454_v32 = vadd.f32 %v2731_v48, %v1371_v41  ;;  %vm1495_vm9 = vcmp.gt.f32.partialorder %v1479_v27, 0.0  ;;  %v1511_v35 = vmul.f32 0.01, %v1479_v27  ;;  %v2389_v21 = vpack.c.bf16 %v1889_v13, %v1888_v56  ;;  %v1890_v19 = vld [vmem:[%s3287_s11 + $0x30] sm:$0xff]  ;;  %v1908_v41 = vld [vmem:[%s3287_s11 + $0xc0] sm:$0xff] }
 0x1ba   : > { %v1393_v61 = vmax.f32 %v1391_v25, %v1392_v9  ;;  %v1404_v58 = vrot.slane %v1403_v37, 2  ;;  %2386 = vmatpush3.bf16.msra.mxu0 %v2385_v59  ;;  %v2391_v25 = vpack.c.bf16 %v1907_v17, %v1906_v24  ;;  %v2393_v9 = vpack.c.bf16 %v1891_v31, %v1890_v19 }
 0x1bb   : > { %v1477_v12 = vadd.f32 %v2957_v11, %v1454_v32  ;;  %v1527_v18 = vsel %vm1495_vm9, %v1479_v27, %v1511_v35  ;;  %2388 = vmatprep.subr.bf16.mxu0 %v2387_v55  ;;  %v1909_v27 = vld [vmem:[%s3287_s11 + $0xc8] sm:$0xff]  ;;  %v1892_v32 = vld [vmem:[%s3287_s11 + $0x40] sm:$0xff]  ;;  %v1425_v39 = vrot.slane %v2731_v48, 3  ;;  %v1417_v45 = vrot.slane %v2741_v52, 2 }
 0x1bc   : > { %v1394_v43 = vrot.slane %v1393_v61, 1  ;;  %v1405_v54 = vmax.f32 %v1403_v37, %v1404_v58  ;;  %v1870_v26 = vrot.slane %v1527_v18, 6  ;;  %v2395_v37 = vpack.c.bf16 %v1909_v27, %v1908_v41  ;;  %v1893_v35 = vld [vmem:[%s3287_s11 + $0x48] sm:$0xff]  ;;  %v1911_v58 = vld [vmem:[%s3287_s11 + $0xd8] sm:$0xff]  ;;  %v1894_v18 = vld [vmem:[%s3287_s11 + $0x50] sm:$0xff] }
 0x1bd   : > { %vm1493_vm10 = vcmp.gt.f32.partialorder %v1477_v12, 0.0  ;;  %v1509_v7 = vmul.f32 0.01, %v1477_v12  ;;  %v2397_v42 = vpack.c.bf16 %v1893_v35, %v1892_v32  ;;  %v1505_v50 = vmul.f32 0.01, %v1473_v14 }
 0x1be   : > { %v1395_v44 = vmax.f32 %v1393_v61, %v1394_v43  ;;  %v1406_v47 = vrot.slane %v1405_v54, 1  ;;  %2390 = vmatpush3.bf16.msra.mxu0 %v2389_v21  ;;  %v1910_v61 = vld [vmem:[%s3287_s11 + $0xd0] sm:$0xff]  ;;  %v1895_v43 = vld [vmem:[%s3287_s11 + $0x58] sm:$0xff]  ;;  %vm1489_vm15 = vcmp.gt.f32.partialorder %v1473_v14, 0.0  ;;  %v1420_v19 = vrot.slane %v2741_v52, 5 }
 0x1bf   : > { %v1525_v20 = vsel %vm1493_vm10, %v1477_v12, %v1509_v7  ;;  %2392 = vmatprep.subr.bf16.mxu0 %v2391_v25  ;;  %v2399_v12 = vpack.c.bf16 %v1911_v58, %v1910_v61  ;;  %v1913_v7 = vld [vmem:[%s3287_s11 + $0xe8] sm:$0xff]  ;;  %v1418_v25 = vrot.slane %v2741_v52, 3  ;;  %v1421_v31 = vrot.slane %v2741_v52, 6 }
 0x1c0   : > { %v3012_v15 = vadd.f32 %v1426_v51, %v1395_v44  ;;  %v1407_v0 = vmax.f32 %v1405_v54, %v1406_v47  ;;  %v1869_v4 = vsel %vm1848_vm2, %v1868_v46, %v1525_v20  ;;  %v1912_v54 = vld [vmem:[%s3287_s11 + $0xe0] sm:$0xff]  ;;  %v2401_v51 = vpack.c.bf16 %v1895_v43, %v1894_v18 }
 0x1c1   : > { %v3017_v40 = vsel %vm1851_vm11, %v1870_v26, %v1869_v4  ;;  %v2403_v46 = vpack.c.bf16 %v1913_v7, %v1912_v54  ;;  %v1422_v54 = vrot.slane %v2741_v52, 7 }
 0x1c2   : > { %v3019_v49 = vadd.f32 %v1428_v36, %v1407_v0  ;;  %2394 = vmatpush3.bf16.msra.mxu0 %v2393_v9 }
 0x1c3   : > { %2396 = vmatprep.subr.bf16.mxu0 %v2395_v37 }
 0x1c4   : > { %v1483_v52 = vadd.f32 %v2957_v11, %v3019_v49 }
 0x1c6   : > { %2398 = vmatpush3.bf16.msra.mxu0 %v2397_v42 }
 0x1c7   : > { %2400 = vmatprep.subr.bf16.mxu0 %v2399_v12 }
 0x1ca   : > { %2402 = vmatpush3.bf16.msra.mxu0 %v2401_v51 }
 0x1cb   : > { %2404 = vmatprep.subr.bf16.mxu0 %v2403_v46 }
 0x21a   : > { %v3104_v44 = vpop.xlane.xlu1 %1643 }
 0x21e   : > { %v3106_v47 = vpop.xlane.xlu1 %1646 }
 0x222   : > { %v1044_v20 = vpop.xlane.xlu1 %1043 }
 0x223   : > { %2456 = vrsqrt.f32 %v1044_v20  ;;  %vm1100_vm0 = vcmp.eq.f32.partialorder %v1044_v20, inf  ;;  %v1103_v4 = vand.u32 2147483648, %v1044_v20  ;;  %vm1102_vm12 = vcmp.eq.f32.partialorder %v1044_v20, 0.0 }
 0x226   : > { %v1047_v26 = vpop.xlane.xlu1 %1046 }
 0x227   : > { %2458 = vrsqrt.f32 %v1047_v26  ;;  %vm1107_vm13 = vcmp.eq.f32.partialorder %v1047_v26, inf  ;;  %v1110_v5 = vand.u32 2147483648, %v1047_v26  ;;  %vm1109_vm14 = vcmp.eq.f32.partialorder %v1047_v26, 0.0 }
 0x22a   : > { %v1053_v0 = vpop.xlane.xlu1 %1052 }
 0x22b   : > { %2460 = vrsqrt.f32 %v1053_v0  ;;  %vm1121_vm2 = vcmp.eq.f32.partialorder %v1053_v0, inf  ;;  %v1124_v56 = vand.u32 2147483648, %v1053_v0  ;;  %vm1123_vm3 = vcmp.eq.f32.partialorder %v1053_v0, 0.0 }
 0x22d   : > { %v2457_v36 = vpop.eup %2456 }
 0x22e   : > { %v1099_v57 = vmul.f32 %v2457_v36, %v1044_v20  ;;  %v1056_v53 = vpop.xlane.xlu1 %1055 }
 0x22f   : > { %2462 = vrsqrt.f32 %v1056_v53  ;;  %vm1128_vm4 = vcmp.eq.f32.partialorder %v1056_v53, inf  ;;  %vm1130_vm5 = vcmp.eq.f32.partialorder %v1056_v53, 0.0  ;;  %v1131_v35 = vand.u32 2147483648, %v1056_v53 }
 0x230   : > { %v1101_v16 = vsel %vm1100_vm0, %v1044_v20, %v1099_v57 }
 0x231   : > { %v2459_v60 = vpop.eup %2458  ;;  %v1104_v29 = vsel %vm1102_vm12, %v1103_v4, %v1101_v16 }
 0x232   : > { %v1205_v38 = vmul.f32 %v2883_v22, %v1104_v29  ;;  %v1106_v3 = vmul.f32 %v2459_v60, %v1047_v26  ;;  %v3111_v33 = vpop.xlane.xlu1 %1058 }
 0x233   : > { %2464 = vrsqrt.f32 %v3111_v33  ;;  %vm1135_vm6 = vcmp.eq.f32.partialorder %v3111_v33, inf  ;;  %vm1137_vm7 = vcmp.eq.f32.partialorder %v3111_v33, 0.0  ;;  %v1138_v29 = vand.u32 2147483648, %v3111_v33 }
 0x234   : > { %v1221_v30 = vadd.f32 %v1205_v38, %v2806_v62  ;;  %v1108_v28 = vsel %vm1107_vm13, %v1047_v26, %v1106_v3  ;;  %v3124_v62 = vsel %vm1489_vm15, %v1473_v14, %v1505_v50  ;;  %vm1854_vm15 = vcmask 1043459  }
 0x235   : > { %v2461_v59 = vpop.eup %2460  ;;  %v1111_v55 = vsel %vm1109_vm14, %v1110_v5, %v1108_v28  ;;  %v1856_v43 = vrot.slane %v3124_v62, 4 }
 0x236   : > { %v1330_v13 = vrot.slane %v1221_v30, 4  ;;  %v1206_v24 = vmul.f32 %v2883_v22, %v1111_v55  ;;  %v1120_v17 = vmul.f32 %v2461_v59, %v1053_v0  ;;  %v3118_v21 = vpop.xlane.xlu1 %1070 }
 0x237   : > { %2466 = vrsqrt.f32 %v3118_v21  ;;  %vm1163_vm8 = vcmp.eq.f32.partialorder %v3118_v21, inf  ;;  %vm1165_vm9 = vcmp.eq.f32.partialorder %v3118_v21, 0.0 }
 0x238   : > { %v1331_v41 = vmax.f32 %v1221_v30, %v1330_v13  ;;  %v1222_v27 = vadd.f32 %v2804_v34, %v1206_v24  ;;  %v1122_v9 = vsel %vm1121_vm2, %v1053_v0, %v1120_v17  ;;  %v1427_v34 = vrot.slane %v2731_v48, 5 }
 0x239   : > { %v2463_v37 = vpop.eup %2462  ;;  %v1125_v32 = vsel %vm1123_vm3, %v1124_v56, %v1122_v9  ;;  %v3137_v0 = vadd.f32 %v2957_v11, %v3012_v15  ;;  %v1166_v30 = vand.u32 2147483648, %v3118_v21  ;;  %vm1857_vm3 = vcmask 1044484  }
 0x23a   : > { %v1332_v61 = vrot.slane %v1331_v41, 2  ;;  %v1336_v58 = vrot.slane %v1222_v27, 4  ;;  %v1208_v42 = vmul.f32 %v2883_v22, %v1125_v32  ;;  %v1127_v12 = vmul.f32 %v2463_v37, %v1056_v53  ;;  %v3128_v18 = vpop.xlane.xlu1 %1076 }
 0x23b   : > { %2468 = vrsqrt.f32 %v3128_v18  ;;  %vm1177_vm10 = vcmp.eq.f32.partialorder %v3128_v18, inf  ;;  %vm1179_vm0 = vcmp.eq.f32.partialorder %v3128_v18, 0.0  ;;  %v1180_v24 = vand.u32 2147483648, %v3128_v18 }
 0x23c   : > { %v1333_v7 = vmax.f32 %v1331_v41, %v1332_v61  ;;  %v1337_v51 = vmax.f32 %v1222_v27, %v1336_v58  ;;  %v1224_v46 = vadd.f32 %v2808_v63, %v1208_v42  ;;  %v1129_v20 = vsel %vm1128_vm4, %v1056_v53, %v1127_v12 }
 0x23d   : > { %v2465_v26 = vpop.eup %2464  ;;  %v1132_v36 = vsel %vm1130_vm5, %v1131_v35, %v1129_v20  ;;  %vm1860_vm4 = vcmask 1045509   ;;  %v1513_v62 = vmul.f32 0.01, %v3137_v0 }
 0x23e   : > { %v1334_v4 = vrot.slane %v1333_v7, 1  ;;  %v1338_v57 = vrot.slane %v1337_v51, 2  ;;  %v1348_v14 = vrot.slane %v1224_v46, 4  ;;  %v1209_v16 = vmul.f32 %v2883_v22, %v1132_v36  ;;  %v3143_v60 = vpop.xlane.xlu1 %1082 }
 0x23f   : > { %v1134_v63 = vmul.f32 %v2465_v26, %v3111_v33  ;;  %2470 = vrsqrt.f32 %v3143_v60  ;;  %vm1191_vm12 = vcmp.eq.f32.partialorder %v3143_v60, inf  ;;  %vm1193_vm13 = vcmp.eq.f32.partialorder %v3143_v60, 0.0 }
 0x240   : > { %v1335_v15 = vmax.f32 %v1333_v7, %v1334_v4  ;;  %v1339_v53 = vmax.f32 %v1337_v51, %v1338_v57  ;;  %v1349_v5 = vmax.f32 %v1224_v46, %v1348_v14  ;;  %v1225_v38 = vadd.f32 %v1209_v16, %v2814_v2 }
 0x241   : > { %v2467_v3 = vpop.eup %2466  ;;  %v1136_v50 = vsel %vm1135_vm6, %v3111_v33, %v1134_v63  ;;  %v1194_v4 = vand.u32 2147483648, %v3143_v60  ;;  %2472 = vrcp.f32 %v3104_v44 }
 0x242   : > { %v1448_v28 = vadd.f32 %v1417_v45, %v1335_v15  ;;  %v1340_v59 = vrot.slane %v1339_v53, 1  ;;  %v1350_v55 = vrot.slane %v1349_v5, 2  ;;  %v1354_v56 = vrot.slane %v1225_v38, 4 }
 0x243   : > { %v1139_v2 = vsel %vm1137_vm7, %v1138_v29, %v1136_v50  ;;  %v1162_v13 = vmul.f32 %v2467_v3, %v3118_v21  ;;  %vm1863_vm7 = vcmask 1046534   ;;  %2474 = vrcp.f32 %v3106_v47 }
 0x244   : > { %v1341_v17 = vmax.f32 %v1339_v53, %v1340_v59  ;;  %v1351_v41 = vmax.f32 %v1349_v5, %v1350_v55  ;;  %v1355_v27 = vmax.f32 %v1225_v38, %v1354_v56  ;;  %v1210_v9 = vmul.f32 %v2883_v22, %v1139_v2 }
 0x245   : > { %v2469_v37 = vpop.eup %2468  ;;  %v1164_v45 = vsel %vm1163_vm8, %v3118_v21, %v1162_v13  ;;  %v1471_v33 = vadd.f32 %v2957_v11, %v1448_v28  ;;  %vm1497_vm8 = vcmp.gt.f32.partialorder %v3137_v0, 0.0 }
 0x246   : > { %v1449_v32 = vadd.f32 %v1418_v25, %v1341_v17  ;;  %v1352_v35 = vrot.slane %v1351_v41, 1  ;;  %v1356_v61 = vrot.slane %v1355_v27, 2  ;;  %v1226_v58 = vadd.f32 %v2812_v1, %v1210_v9 }
 0x247   : > { %v1167_v42 = vsel %vm1165_vm9, %v1166_v30, %v1164_v45  ;;  %v1176_v12 = vmul.f32 %v2469_v37, %v3128_v18  ;;  %vm1487_vm14 = vcmp.gt.f32.partialorder %v1471_v33, 0.0  ;;  %v1503_v7 = vmul.f32 0.01, %v1471_v33 }
 0x248   : > { %v1353_v51 = vmax.f32 %v1351_v41, %v1352_v35  ;;  %v1357_v46 = vmax.f32 %v1355_v27, %v1356_v61  ;;  %v1360_v20 = vrot.slane %v1226_v58, 4  ;;  %v1214_v26 = vmul.f32 %v2883_v22, %v1167_v42 }
 0x249   : > { %v2471_v36 = vpop.eup %2470  ;;  %v1178_v25 = vsel %vm1177_vm10, %v3128_v18, %v1176_v12  ;;  %v1472_v1 = vadd.f32 %v2957_v11, %v1449_v32  ;;  %v1519_v21 = vsel %vm1487_vm14, %v1471_v33, %v1503_v7  ;;  %vm1866_vm9 = vcmask 1047559  }
 0x24a   : > { %v1358_v57 = vrot.slane %v1357_v46, 1  ;;  %v1361_v14 = vmax.f32 %v1226_v58, %v1360_v20  ;;  %v1230_v16 = vadd.f32 %v2820_v6, %v1214_v26  ;;  %v1181_v63 = vsel %vm1179_vm0, %v1180_v24, %v1178_v25 }
 0x24b   : > { %v1216_v29 = vmul.f32 %v2883_v22, %v1181_v63  ;;  %v1190_v15 = vmul.f32 %v2471_v36, %v3143_v60  ;;  %v1451_v53 = vadd.f32 %v1420_v19, %v1353_v51  ;;  %vm1488_vm2 = vcmp.gt.f32.partialorder %v1472_v1, 0.0 }
 0x24c   : > { %v1362_v5 = vrot.slane %v1361_v14, 2  ;;  %v1384_v38 = vrot.slane %v1230_v16, 4  ;;  %v1359_v3 = vmax.f32 %v1357_v46, %v1358_v57  ;;  %v1504_v50 = vmul.f32 0.01, %v1472_v1 }
 0x24d   : > { %v1232_v6 = vadd.f32 %v2824_v8, %v1216_v29  ;;  %v1192_v18 = vsel %vm1191_vm12, %v3143_v60, %v1190_v15  ;;  %v1474_v30 = vadd.f32 %v2957_v11, %v1451_v53  ;;  %v1850_v28 = vrot.slane %v1519_v21, 6 }
 0x24e   : > { %v1385_v59 = vmax.f32 %v1230_v16, %v1384_v38  ;;  %v1195_v19 = vsel %vm1193_vm13, %v1194_v4, %v1192_v18  ;;  %v1363_v55 = vmax.f32 %v1361_v14, %v1362_v5  ;;  %v1452_v56 = vadd.f32 %v1421_v31, %v1359_v3 }
 0x24f   : > { %v1396_v2 = vrot.slane %v1232_v6, 4  ;;  %v1218_v13 = vmul.f32 %v2883_v22, %v1195_v19  ;;  %vm1490_vm5 = vcmp.gt.f32.partialorder %v1474_v30, 0.0  ;;  %v1506_v8 = vmul.f32 0.01, %v1474_v30 }
 0x250   : > { %v1386_v24 = vrot.slane %v1385_v59, 2  ;;  %v1364_v17 = vrot.slane %v1363_v55, 1  ;;  %v1475_v41 = vadd.f32 %v2957_v11, %v1452_v56  ;;  %v1520_v27 = vsel %vm1488_vm2, %v1472_v1, %v1504_v50 }
 0x251   : > { %v1397_v9 = vmax.f32 %v1232_v6, %v1396_v2  ;;  %v1234_v37 = vadd.f32 %v2828_v10, %v1218_v13  ;;  %v1522_v60 = vsel %vm1490_vm5, %v1474_v30, %v1506_v8  ;;  %v1852_v45 = vsel %vm1851_vm11, %v1850_v28, %v2995_v23  ;;  %v2473_v8 = vpop.eup %2472 }
 0x252   : > { %v1387_v33 = vmax.f32 %v1385_v59, %v1386_v24  ;;  %v1365_v31 = vmax.f32 %v1363_v55, %v1364_v17  ;;  %vm1491_vm6 = vcmp.gt.f32.partialorder %v1475_v41, 0.0  ;;  %v1507_v32 = vmul.f32 0.01, %v1475_v41 }
 0x253   : > { %v1398_v22 = vrot.slane %v1397_v9, 2  ;;  %v1408_v35 = vrot.slane %v1234_v37, 4  ;;  %v1853_v61 = vrot.slane %v1520_v27, 5  ;;  %v1859_v58 = vrot.slane %v1522_v60, 3 }
 0x254   : > { %v1388_v42 = vrot.slane %v1387_v33, 1  ;;  %v1453_v12 = vadd.f32 %v1422_v54, %v1365_v31  ;;  %v1523_v7 = vsel %vm1491_vm6, %v1475_v41, %v1507_v32  ;;  %v1429_v25 = vrot.slane %v2731_v48, 7  ;;  %v2475_v41 = vpop.eup %2474  ;;  %v1914_v32 = vld [vmem:[%s3287_s11 + $0xf0] sm:$0xff] }
 0x255   : > { %v1399_v51 = vmax.f32 %v1397_v9, %v1398_v22  ;;  %v1409_v10 = vmax.f32 %v1234_v37, %v1408_v35  ;;  %v1855_v46 = vsel %vm1854_vm15, %v1853_v61, %v1852_v45  ;;  %v1862_v20 = vrot.slane %v1523_v7, 2  ;;  %v1896_v45 = vld [vmem:[%s3287_s11 + $0x60] sm:$0xff]  ;;  %v1915_v22 = vld [vmem:[%s3287_s11 + $0xf8] sm:$0xff]  ;;  %v1898_v35 = vld [vmem:[%s3287_s11 + $0x70] sm:$0xff] }
 0x256   : > { %v1389_v23 = vmax.f32 %v1387_v33, %v1388_v42  ;;  %v1476_v26 = vadd.f32 %v2957_v11, %v1453_v12  ;;  %v1858_v36 = vsel %vm1857_vm3, %v1856_v43, %v1855_v46  ;;  %vm1499_vm0 = vcmp.gt.f32.partialorder %v1483_v52, 0.0  ;;  %v1897_v33 = vld [vmem:[%s3287_s11 + $0x68] sm:$0xff]  ;;  %v2196_v12 = vld [vmem:[%s3286_s10] ss:$0 sm:$0xff] }
 0x257   : > { %v1410_v54 = vrot.slane %v1409_v10, 2  ;;  %v1861_v4 = vsel %vm1860_vm4, %v1859_v58, %v1858_v36  ;;  %v1400_v1 = vrot.slane %v1399_v51, 1  ;;  %v1515_v5 = vmul.f32 0.01, %v1483_v52  ;;  %v1899_v58 = vld [vmem:[%s3287_s11 + $0x78] sm:$0xff] }
 0x258   : > { %vm1492_vm11 = vcmp.gt.f32.partialorder %v1476_v26, 0.0  ;;  %v1508_v21 = vmul.f32 0.01, %v1476_v26  ;;  %v1864_v57 = vsel %vm1863_vm7, %v1862_v20, %v1861_v4  ;;  %v1457_v14 = vadd.f32 %v1425_v39, %v1389_v23 }
 0x259   : > { %v1401_v43 = vmax.f32 %v1399_v51, %v1400_v1  ;;  %v1411_v16 = vmax.f32 %v1409_v10, %v1410_v54  ;;  %v1529_v50 = vsel %vm1497_vm8, %v3137_v0, %v1513_v62  ;;  %v1531_v48 = vsel %vm1499_vm0, %v1483_v52, %v1515_v5  ;;  %v2200_v52 = vld [vmem:[%s3288_s12] ss:$0 sm:$0xff] }
 0x25a   : > { %v1524_v49 = vsel %vm1492_vm11, %v1476_v26, %v1508_v21  ;;  %v1480_v63 = vadd.f32 %v2957_v11, %v1457_v14  ;;  %v1878_v0 = vrot.slane %v1531_v48, 2  ;;  %v2405_v31 = vpack.c.bf16 %v1897_v33, %v1896_v45 }
 0x25b   : > { %v1865_v29 = vrot.slane %v1524_v49, 1  ;;  %v1412_v15 = vrot.slane %v1411_v16, 1  ;;  %v1459_v53 = vadd.f32 %v1427_v34, %v1401_v43  ;;  %v1874_v34 = vrot.slane %v1529_v50, 4 }
 0x25c   : > { %vm1496_vm10 = vcmp.gt.f32.partialorder %v1480_v63, 0.0  ;;  %v1512_v39 = vmul.f32 0.01, %v1480_v63  ;;  %2406 = vmatpush3.bf16.msra.mxu0 %v2405_v31  ;;  %v2407_v61 = vpack.c.bf16 %v1915_v22, %v1914_v32  ;;  %v2409_v42 = vpack.c.bf16 %v1899_v58, %v1898_v35 }
 0x25d   : > { %v1867_v38 = vsel %vm1866_vm9, %v1865_v29, %v1864_v57  ;;  %v1413_v3 = vmax.f32 %v1411_v16, %v1412_v15  ;;  %v1482_v44 = vadd.f32 %v2957_v11, %v1459_v53 }
 0x25e   : > { %v1528_v6 = vsel %vm1496_vm10, %v1480_v63, %v1512_v39  ;;  %2408 = vmatprep.subr.bf16.mxu0 %v2407_v61 }
 0x25f   : > { %v1461_v47 = vadd.f32 %v1429_v25, %v1413_v3  ;;  %vm1498_vm12 = vcmp.gt.f32.partialorder %v1482_v44, 0.0  ;;  %v1514_v18 = vmul.f32 0.01, %v1482_v44  ;;  %v1872_v30 = vrot.slane %v1528_v6, 5 }
 0x260   : > { %2410 = vmatpush3.bf16.msra.mxu0 %v2409_v42 }
 0x261   : > { %v1484_v28 = vadd.f32 %v2957_v11, %v1461_v47  ;;  %v1530_v59 = vsel %vm1498_vm12, %v1482_v44, %v1514_v18  ;;  %v1873_v19 = vsel %vm1854_vm15, %v1872_v30, %v3017_v40 }
 0x262   : > { %v1875_v55 = vsel %vm1857_vm3, %v1874_v34, %v1873_v19  ;;  %v1876_v56 = vrot.slane %v1530_v59, 3 }
 0x263   : > { %v2369_v2 = vpop.f32.mrb[4].mxu1  ;;  %vm1500_vm13 = vcmp.gt.f32.partialorder %v1484_v28, 0.0  ;;  %v1516_v13 = vmul.f32 0.01, %v1484_v28 }
 0x264   : > { %v1720_v24 = vpop.f32.mrb[5].mxu1  ;;  %v1877_v17 = vsel %vm1860_vm4, %v1876_v56, %v1875_v55  ;;  %v1732_v37 = vmul.f32 %v2475_v41, %v2369_v2 }
 0x265   : > { %v1731_v27 = vmul.f32 %v2473_v8, %v1720_v24  ;;  %v1532_v9 = vsel %vm1500_vm13, %v1484_v28, %v1516_v13  ;;  %v1879_v11 = vsel %vm1863_vm7, %v1878_v0, %v1877_v17 }
 0x266   : > { %v1880_v60 = vrot.slane %v1532_v9, 1 }
 0x267   : > { %2372 = vmatprep.mubr.msk.f32.mxu1 %vm626_vm1, %v1731_v27 }
 0x268   : > { %2373 = vmatmul.mubr.msk.f32.vlgmr.msra.gmra.mrb[6].mxu1 %vm626_vm1, %v1732_v37  ;;  %v1881_v40 = vsel %vm1866_vm9, %v1880_v60, %v1879_v11 }
 0x33b   : > { %v2374_v7 = vpop.f32.mrb[6].mxu1 }
 0x33c   : > { %v1822_v51 = vadd.f32 %v2374_v7, %v2196_v12  ;;  %v1816_v10 = vpop.f32.mrb[7].mxu1 }
 0x33d   : > { %v1817_v46 = vadd.f32 %v2196_v12, %v1816_v10 }
 0x33e   : > { %v1828_v20 = vmul.f32 0.01, %v1822_v51  ;;  %vm1826_vm14 = vcmp.gt.f32.partialorder %v1822_v51, 0.0 }
 0x33f   : > { %v1827_v23 = vmul.f32 0.01, %v1817_v46  ;;  %vm1825_vm1 = vcmp.gt.f32.partialorder %v1817_v46, 0.0 }
 0x340   : > { %v1830_v36 = vsel %vm1826_vm14, %v1822_v51, %v1828_v20 }
 0x341   : > { %v1829_v26 = vsel %vm1825_vm1, %v1817_v46, %v1827_v23 }
 0x342   : > { %1987 = vmatprep.mubr.f32.mxu0 %v1829_v26 }
 0x343   : > { %1988 = vmatmul.mubr.f32.vlgmr.msra.gmra.mrb[16].mxu0 %v1867_v38 }
 0x344   : > { %1992 = vmatprep.mubr.f32.mxu0 %v1830_v36 }
 0x347   : > { %1993 = vmatmul.mubr.f32.gmra.mrb[18].mxu0 %v1881_v40 }
 0x416   : > { %v2321_v25 = vpop.f32.mrb[16].mxu0 }
 0x417   : > { %v2322_v54 = vpop.f32.mrb[17].mxu0 }
 0x418   : > { %v2323_v4 = vadd.f32 %v2322_v54, %v2321_v25 }
 0x41a   : > { %v1990_v1 = vadd.f32 %v2323_v4, %v2200_v52  ;;  %v2324_v21 = vpop.f32.mrb[18].mxu0 }
 0x41b   : > { %v2325_v57 = vpop.f32.mrb[19].mxu0 }
 0x41c   : > { %vm1998_vm15 = vcmp.gt.f32.partialorder %v1990_v1, 0.0  ;;  %v2000_v14 = vmul.f32 0.01, %v1990_v1  ;;  %v2326_v62 = vadd.f32 %v2325_v57, %v2324_v21 }
 0x41e   : > { %v2002_v43 = vsel %vm1998_vm15, %v1990_v1, %v2000_v14  ;;  %v1995_v16 = vadd.f32 %v2326_v62, %v2200_v52 }
 0x41f   : > { %2004 = vst [vmem:[%s587_s21] sm:$0xff] %v2002_v43 }
 0x420   : > { %vm1999_vm2 = vcmp.gt.f32.partialorder %v1995_v16, 0.0  ;;  %v2001_v49 = vmul.f32 0.01, %v1995_v16 }
 0x422   : > { %v2003_v63 = vsel %vm1999_vm2, %v1995_v16, %v2001_v49 }
 0x423   : > { %2005 = vst [vmem:[%s587_s21 + $0x8] sm:$0xff] %v2003_v63 }
 0x424 PF: > { %s23_s27 = sadd.s32 1, %s2498_s27   ;;  %s3290_s25 = smov %s2494_s26 }
 0x425   : > { %p20_p5 = scmp.ge.s32.totalorder %s23_s27, 4   ;;  %s3291_s26 = smov %s3293_s28 }
 0x427   :  { %22 = sbr.rel (!%p20_p5) target bundleno = 2 (0x2), region = 114 }

</bundles_post_ra>
